<compile_context>
chip_gen: v7x
topology: tpu7x:2x2x1
jax: 0.10.0
libtpu: 0.0.40
codegen_flags: <defaults>
</compile_context>

<pallas_src>
import functools

import numpy as np

import jax
import jax.numpy as jnp
from jax.experimental import pallas as pl
from jax.experimental.pallas import tpu as pltpu

VMEM = pltpu.MemorySpace.VMEM
_NT = (((1,), (1,)), ((), ()))          # contract dim 1 of lhs with dim 1 of rhs


def _approx_recip(x):
    if hasattr(pl, "reciprocal"):
        return pl.reciprocal(x, approx=True)
    return 1.0 / x


def _vmem_limit_bytes():
    """Per-generation scoped-VMEM limit: ~70% of physical, capped."""
    try:
        cap = int(pltpu.get_tpu_info().vmem_capacity_bytes)
    except Exception:
        cap = 64 * 1024 * 1024          # conservative (v7x-sized) fallback
    return max(32 * 1024 * 1024, min(int(cap * 0.7), 100 * 1024 * 1024))


# ---------------------------------------------------------------------------
# rel_shift (exact Transformer-XL semantics)
# ---------------------------------------------------------------------------

def _np_rel_shift(x):
    """Exact PyTorch _rel_shift on a 2-D numpy array (probe reference)."""
    q, r = x.shape
    pad = np.concatenate([np.zeros((q, 1), x.dtype), x], axis=1)
    return pad.reshape(-1)[q:].reshape(q, r)


def _rel_shift_strided(bd, q_len, r_len, keep_main, is_zero):
    """rel_shift via ONE strided pltpu.roll (per-row lane rotation) + 2 selects.

    Wanted: x[i, j] = bd[i, (j + q_len-1-i) mod r_len].  As a jnp.roll-style
    right shift that is shift_i = (r_len - q_len + 1) + i = shift + i*stride.
    Requires r_len >= q_len (true here: rlen == klen == qlen).
    """
    if q_len == 1:
        return bd
    x = pltpu.roll(bd, shift=r_len - q_len + 1, axis=1, stride=1, stride_axis=0)
    x_up = jnp.concatenate([x[1:, :], x[:1, :]], axis=0)      # row i -> row i+1
    return jnp.where(keep_main, x, jnp.where(is_zero, 0.0, x_up))


def _rel_shift_fallback(bd, q_len, r_len, amt, keep_main, is_zero):
    """rel_shift via binary-decomposed per-row circular roll (verified fallback)."""
    if q_len == 1:
        return bd
    x = bd
    for bit in range((q_len - 1).bit_length()):
        k = 1 << bit                                           # k <= q_len-1 <= r_len-1
        rolled = jnp.concatenate([x[:, k:], x[:, :k]], axis=1)
        take = ((amt >> bit) & 1) == 1
        x = jnp.where(take, rolled, x)
    x_up = jnp.concatenate([x[1:, :], x[:1, :]], axis=0)
    return jnp.where(keep_main, x, jnp.where(is_zero, 0.0, x_up))


@functools.lru_cache(maxsize=None)
def _use_strided_roll(q_len, r_len):
    """Probe once per (Q, R): does the strided pltpu.roll path reproduce the exact
    PyTorch rel_shift on this TPU / JAX version?  If not (or it fails to lower),
    the attention kernel uses the concat-based fallback."""
    if q_len <= 1:
        return False
    x_np = (np.arange(q_len * r_len) % 8191).astype(np.float32).reshape(q_len, r_len)
    want = _np_rel_shift(x_np)

    def probe(x_ref, o_ref):
        rows = jax.lax.broadcasted_iota(jnp.int32, (q_len, r_len), 0)
        cols = jax.lax.broadcasted_iota(jnp.int32, (q_len, r_len), 1)
        d = cols - rows
        o_ref[...] = _rel_shift_strided(x_ref[...], q_len, r_len,
                                        d <= r_len - q_len,
                                        d == r_len - q_len + 1)

    try:
        got = pl.pallas_call(
            probe,
            out_shape=jax.ShapeDtypeStruct((q_len, r_len), jnp.float32),
            in_specs=[pl.BlockSpec(memory_space=VMEM)],
            out_specs=pl.BlockSpec(memory_space=VMEM),
        )(jnp.asarray(x_np))
        got = np.asarray(jax.block_until_ready(got))
        return bool(np.array_equal(got, want))
    except Exception:
        return False


# ---------------------------------------------------------------------------
# Kernel bodies
# ---------------------------------------------------------------------------

def _fused_attn_kernel(x_ref, qw_ref, kw_ref, vw_ref, rk_ref, brows_ref, o_ref,
                       *, heads_per_step, d_head, use_strided):
    q_len = x_ref.shape[0]
    r_len = rk_ref.shape[0]
    k_len = q_len                                   # no-mems path: klen == qlen

    x_bf = x_ref[...].astype(jnp.bfloat16)          # (Q, D)

    # Per-group projections (softmax scale already folded into qw); bf16 once,
    # no f32 qkv buffer kept live.
    q_all = jax.lax.dot_general(x_bf, qw_ref[...], _NT,
                                preferred_element_type=jnp.float32).astype(jnp.bfloat16)
    k_all = jax.lax.dot_general(x_bf, kw_ref[...], _NT,
                                preferred_element_type=jnp.float32).astype(jnp.bfloat16)
    v_all = jax.lax.dot_general(x_bf, vw_ref[...], _NT,
                                preferred_element_type=jnp.float32).astype(jnp.bfloat16)

    # Shared key-side RHS for the fused AC|BD matmul: [K rows | R rows].
    kr_all = jnp.concatenate([k_all, rk_ref[...]], axis=0)      # (K+R, sub) bf16
    brows = brows_ref[...]                                      # (2, sub) bf16, pre-scaled

    # rel-shift masks built once per grid step (hoisted out of the head loop).
    rows = jax.lax.broadcasted_iota(jnp.int32, (q_len, r_len), 0)
    cols = jax.lax.broadcasted_iota(jnp.int32, (q_len, r_len), 1)
    d = cols - rows
    keep_main = d <= (r_len - q_len)
    is_zero = d == (r_len - q_len + 1)
    amt = None if use_strided else (q_len - 1) - rows

    for hl in range(heads_per_step):
        lo, hi = hl * d_head, (hl + 1) * d_head
        q_h = q_all[:, lo:hi]                                   # (Q, Dh) bf16
        kr_h = kr_all[:, lo:hi]                                 # (K+R, Dh) bf16
        v_h = v_all[:, lo:hi]                                   # (K, Dh) bf16

        # One MXU pass gives [AC | BD-pre-shift]; rank-1 bias terms added as rows.
        s = jax.lax.dot_general(q_h, kr_h, _NT,
                                preferred_element_type=jnp.float32)      # (Q, K+R)
        bb = jax.lax.dot_general(brows[:, lo:hi], kr_h, _NT,
                                 preferred_element_type=jnp.float32)     # (2, K+R)
        ac = s[:, :k_len] + bb[0:1, :k_len]
        bd = s[:, k_len:] + bb[1:2, k_len:]
        if use_strided:
            bd = _rel_shift_strided(bd, q_len, r_len, keep_main, is_zero)
        else:
            bd = _rel_shift_fallback(bd, q_len, r_len, amt, keep_main, is_zero)

        sc = ac + bd                                            # already scaled
        m = jnp.max(sc, axis=-1, keepdims=True)
        p = jnp.exp(sc - m)
        denom = jnp.sum(p, axis=-1, keepdims=True)
        p = p * _approx_recip(denom)                            # softmax over keys

        pv = jnp.dot(p.astype(jnp.bfloat16), v_h,
                     preferred_element_type=jnp.float32)        # (Q, Dh)
        o_ref[:, lo:hi] = pv.astype(o_ref.dtype)                # direct per-head write


def _layernorm(x, g, b, eps=1e-5):
    # independent mean / mean-of-squares reductions (no sequential 2-pass mean)
    m1 = jnp.mean(x, axis=-1, keepdims=True)
    m2 = jnp.mean(x * x, axis=-1, keepdims=True)
    var = jnp.maximum(m2 - m1 * m1, 0.0)
    return (x - m1) * jax.lax.rsqrt(var + eps) * g + b


def _post_attn_kernel(av_ref, res_ref, o_w_ref, g1_ref, b1_ref,
                      w1_ref, fb1_ref, w2_ref, fb2_ref, g2_ref, b2_ref, o_ref):
    # o_net + residual + LN1
    attn_out = jax.lax.dot_general(av_ref[...], o_w_ref[...], _NT,
                                   preferred_element_type=jnp.float32)   # (TM, D)
    y = _layernorm(res_ref[...] + attn_out, g1_ref[...], b1_ref[...])

    # PositionwiseFF (post-lnorm): LN(y + W2 relu(W1 y + b1) + b2)
    h = jax.lax.dot_general(y.astype(jnp.bfloat16), w1_ref[...], _NT,
                            preferred_element_type=jnp.float32) + fb1_ref[...]
    h = jnp.maximum(h, 0.0)
    core = jax.lax.dot_general(h.astype(jnp.bfloat16), w2_ref[...], _NT,
                               preferred_element_type=jnp.float32) + fb2_ref[...]

    o_ref[...] = _layernorm(y + core, g2_ref[...], b2_ref[...]).astype(o_ref.dtype)


# ---------------------------------------------------------------------------
# pallas_call wrappers
# ---------------------------------------------------------------------------

def _row_tile(n, target=256):
    for t in (target, 128, 64, 32, 16, 8):
        if t <= n and n % t == 0:
            return t
    return n


def _pick_head_groups(n_head, d_head):
    # Second (parallel) grid axis over head groups -- gives v7x's 2 TensorCores
    # work even at batch 1-2.  Only when the per-group column width stays
    # 128-lane tileable for every BlockSpec; otherwise a single group.
    if n_head % 2 == 0 and ((n_head // 2) * d_head) % 128 == 0:
        return 2
    return 1


def fused_attention(x_bqd, q_w, k_w, v_w, rk, brows, *, n_head, d_head):
    bsz, q_len, d_model = x_bqd.shape
    hd = n_head * d_head
    r_len = rk.shape[0]
    n_groups = _pick_head_groups(n_head, d_head)
    hg = n_head // n_groups
    sub = hg * d_head

    kernel = functools.partial(
        _fused_attn_kernel, heads_per_step=hg, d_head=d_head,
        use_strided=_use_strided_roll(q_len, r_len))

    return pl.pallas_call(
        kernel,
        out_shape=jax.ShapeDtypeStruct((bsz, q_len, hd), jnp.bfloat16),
        grid=(bsz, n_groups),
        in_specs=[
            pl.BlockSpec((None, q_len, d_model), lambda b, g: (b, 0, 0)),  # x (per batch)
            pl.BlockSpec((sub, d_model), lambda b, g: (g, 0)),             # q_w (scaled)
            pl.BlockSpec((sub, d_model), lambda b, g: (g, 0)),             # k_w
            pl.BlockSpec((sub, d_model), lambda b, g: (g, 0)),             # v_w
            pl.BlockSpec((r_len, sub), lambda b, g: (0, g)),               # r_head_k
            pl.BlockSpec((2, sub), lambda b, g: (0, g)),                   # bias rows
        ],
        out_specs=pl.BlockSpec((None, q_len, sub), lambda b, g: (b, 0, g)),
        compiler_params=pltpu.CompilerParams(
            dimension_semantics=("parallel", "parallel"),
            vmem_limit_bytes=_vmem_limit_bytes()),
    )(x_bqd, q_w, k_w, v_w, rk, brows)


def post_attention(av2d, res2d, p):
    m_rows, hd = av2d.shape
    d_model = res2d.shape[1]
    d_inner = p["ff_w1"].shape[0]
    tm = _row_tile(m_rows)
    return pl.pallas_call(
        _post_attn_kernel,
        out_shape=jax.ShapeDtypeStruct((m_rows, d_model), jnp.float32),
        grid=(m_rows // tm,),
        in_specs=[
            pl.BlockSpec((tm, hd), lambda i: (i, 0)),
            pl.BlockSpec((tm, d_model), lambda i: (i, 0)),
            pl.BlockSpec((d_model, hd), lambda i: (0, 0)),       # o_w
            pl.BlockSpec((1, d_model), lambda i: (0, 0)),        # ln1_g
            pl.BlockSpec((1, d_model), lambda i: (0, 0)),        # ln1_b
            pl.BlockSpec((d_inner, d_model), lambda i: (0, 0)),  # ff_w1
            pl.BlockSpec((1, d_inner), lambda i: (0, 0)),        # ff_b1
            pl.BlockSpec((d_model, d_inner), lambda i: (0, 0)),  # ff_w2
            pl.BlockSpec((1, d_model), lambda i: (0, 0)),        # ff_b2
            pl.BlockSpec((1, d_model), lambda i: (0, 0)),        # ln2_g
            pl.BlockSpec((1, d_model), lambda i: (0, 0)),        # ln2_b
        ],
        out_specs=pl.BlockSpec((tm, d_model), lambda i: (i, 0)),
        compiler_params=pltpu.CompilerParams(
            dimension_semantics=("parallel",),
            vmem_limit_bytes=_vmem_limit_bytes()),
    )(av2d, res2d, p["o_w"], p["ln1_g"], p["ln1_b"],
      p["ff_w1"], p["ff_b1"], p["ff_w2"], p["ff_b2"],
      p["ln2_g"], p["ln2_b"])


# ---------------------------------------------------------------------------
# Full decoder-layer forward
# ---------------------------------------------------------------------------

def prepare_params(params, d_head):
    """One-time prep: split qkv, fold softmax scale into q weights, matmul
    weights -> bf16 (PyTorch (out,in) layout kept), biases / LN -> (1,N) f32."""
    bf, f32 = jnp.bfloat16, jnp.float32
    hd = params["qkv_w"].shape[0] // 3
    scale = 1.0 / (d_head ** 0.5)
    qkv = params["qkv_w"]
    return {
        "q_w": (qkv[:hd] * scale).astype(bf),       # softmax scale folded in
        "k_w": qkv[hd:2 * hd].astype(bf),
        "v_w": qkv[2 * hd:].astype(bf),
        "r_w": params["r_w"].astype(bf),
        "o_w": params["o_w"].astype(bf),
        "ln1_g": params["ln1_g"].reshape(1, -1).astype(f32),
        "ln1_b": params["ln1_b"].reshape(1, -1).astype(f32),
        "ff_w1": params["ff_w1"].astype(bf),
        "ff_b1": params["ff_b1"].reshape(1, -1).astype(f32),
        "ff_w2": params["ff_w2"].astype(bf),
        "ff_b2": params["ff_b2"].reshape(1, -1).astype(f32),
        "ln2_g": params["ln2_g"].reshape(1, -1).astype(f32),
        "ln2_b": params["ln2_b"].reshape(1, -1).astype(f32),
    }


def decoder_layer_forward(dec_inp, r, r_w_bias, r_r_bias, p):
    q_len, bsz, d_model = dec_inp.shape
    n_head, d_head = r_w_bias.shape
    hd = n_head * d_head
    r_len = r.shape[0]
    assert r_len == q_len, "no-mems / no-mask path assumes rlen == klen == qlen"
    scale = 1.0 / (d_head ** 0.5)

    # Boundary layout change only: (Q,B,D) -> (B,Q,D); undone once at the end.
    x_bqd = jnp.transpose(dec_inp, (1, 0, 2))

    # r_net as a plain XLA GEMM (no kernel launch needed for one small matmul).
    rk = jax.lax.dot_general(r.astype(jnp.bfloat16), p["r_w"], _NT,
                             preferred_element_type=jnp.float32).astype(jnp.bfloat16)

    # rank-1 bias rows [r_w_bias ; r_r_bias], pre-scaled like the q weights.
    brows = (jnp.stack([r_w_bias.reshape(-1), r_r_bias.reshape(-1)], axis=0)
             * scale).astype(jnp.bfloat16)

    attn_vec = fused_attention(x_bqd, p["q_w"], p["k_w"], p["v_w"], rk, brows,
                               n_head=n_head, d_head=d_head)      # (B, Q, H*Dh)
    out2d = post_attention(attn_vec.reshape(bsz * q_len, hd),
                           x_bqd.reshape(bsz * q_len, d_model), p)
    return jnp.transpose(out2d.reshape(bsz, q_len, d_model), (1, 0, 2))


# ---------------------------------------------------------------------------
# Pure-JAX f32 reference mirroring the PyTorch module (for self-check)
# ---------------------------------------------------------------------------

def reference_forward(dec_inp, r, r_w_bias, r_r_bias, p):
    Q, B, D = dec_inp.shape
    H, Dh = r_w_bias.shape
    R = r.shape[0]
    scale = 1.0 / (Dh ** 0.5)

    w_heads = jnp.einsum("ibd,od->ibo", dec_inp, p["qkv_w"])
    r_head_k = (r @ p["r_w"].T).reshape(R, H, Dh)
    q, k, v = jnp.split(w_heads, 3, axis=-1)
    q = q.reshape(Q, B, H, Dh)
    k = k.reshape(Q, B, H, Dh)
    v = v.reshape(Q, B, H, Dh)

    AC = jnp.einsum("ibnd,jbnd->ijbn", q + r_w_bias, k)
    BD = jnp.einsum("ibnd,jnd->ijbn", q + r_r_bias, r_head_k)
    zp = jnp.zeros((Q, 1, B, H), BD.dtype)
    BDp = jnp.concatenate([zp, BD], axis=1).reshape(R + 1, Q, B, H)
    BD = BDp[1:].reshape(Q, R, B, H)

    score = (AC + BD) * scale
    prob = jax.nn.softmax(score, axis=1)
    attn_vec = jnp.einsum("ijbn,jbnd->ibnd", prob, v).reshape(Q, B, H * Dh)
    attn_out = attn_vec @ p["o_w"].T

    def ln(x, g, b):
        mu = x.mean(-1, keepdims=True)
        var = ((x - mu) ** 2).mean(-1, keepdims=True)
        return (x - mu) / jnp.sqrt(var + 1e-5) * g + b

    y = ln(dec_inp + attn_out, p["ln1_g"], p["ln1_b"])
    h = jax.nn.relu(y @ p["ff_w1"].T + p["ff_b1"])
    core = h @ p["ff_w2"].T + p["ff_b2"]
    return ln(y + core, p["ln2_g"], p["ln2_b"])


# ---------------------------------------------------------------------------

if __name__ == "__main__":
    qlen, bsz = 8, 2
    n_head, d_head = 8, 32                      # hd=256 -> exercises 2 head groups
    d_model, d_inner = 128, 256
    rlen = qlen                                 # no mems -> klen == rlen == qlen

    key = jax.random.PRNGKey(0)
    ks = jax.random.split(key, 12)

    params = {
        "qkv_w": 0.10 * jax.random.normal(ks[0], (3 * n_head * d_head, d_model), jnp.float32),
        "r_w":   0.10 * jax.random.normal(ks[1], (n_head * d_head, d_model), jnp.float32),
        "o_w":   0.10 * jax.random.normal(ks[2], (d_model, n_head * d_head), jnp.float32),
        "ln1_g": 1.0 + 0.1 * jax.random.normal(ks[3], (d_model,), jnp.float32),
        "ln1_b": 0.1 * jax.random.normal(ks[4], (d_model,), jnp.float32),
        "ff_w1": 0.05 * jax.random.normal(ks[5], (d_inner, d_model), jnp.float32),
        "ff_b1": 0.1 * jax.random.normal(ks[6], (d_inner,), jnp.float32),
        "ff_w2": 0.05 * jax.random.normal(ks[7], (d_model, d_inner), jnp.float32),
        "ff_b2": 0.1 * jax.random.normal(ks[8], (d_model,), jnp.float32),
        "ln2_g": 1.0 + 0.1 * jax.random.normal(ks[9], (d_model,), jnp.float32),
        "ln2_b": 0.1 * jax.random.normal(ks[10], (d_model,), jnp.float32),
    }

    ki = jax.random.split(ks[11], 4)
    dec_inp = jax.random.normal(ki[0], (qlen, bsz, d_model), jnp.float32)
    r = jax.random.normal(ki[1], (rlen, d_model), jnp.float32)
    r_w_bias = 0.5 * jax.random.normal(ki[2], (n_head, d_head), jnp.float32)
    r_r_bias = 0.5 * jax.random.normal(ki[3], (n_head, d_head), jnp.float32)

    prepped = prepare_params(params, d_head=d_head)   # one-time bf16 weight prep
    _use_strided_roll(qlen, rlen)                     # warm the rel-shift probe

    fwd = jax.jit(decoder_layer_forward)
    out = jax.block_until_ready(fwd(dec_inp, r, r_w_bias, r_r_bias, prepped))

    ref = reference_forward(dec_inp, r, r_w_bias, r_r_bias, params)
    assert out.shape == (qlen, bsz, d_model)
    max_diff = jnp.max(jnp.abs(out - ref))
    assert jnp.allclose(out, ref, rtol=2e-2, atol=2e-2), \
        f"max abs diff {max_diff}"

    print("KERNEL_OK")
</pallas_src>

<mosaic_0001>
module attributes {stable_mosaic.version = 11 : i64} {
  func.func @probe(%arg0: memref<8x8xf32, #tpu.memory_space<vmem>>, %arg1: memref<8x8xf32, #tpu.memory_space<vmem>>) attributes {dimension_semantics = [], scalar_prefetch = 0 : i64, scratch_operands = 0 : i64, tpu.core_type = #tpu.core_type<tc>} {
    %0 = tpu.iota {dimensions = array<i32: 0>} : vector<8x8xi32>
    %1 = tpu.iota {dimensions = array<i32: 1>} : vector<8x8xi32>
    %2 = arith.subi %1, %0 : vector<8x8xi32>
    %c0 = arith.constant 0 : index
    %c0_0 = arith.constant 0 : index
    %3 = vector.load %arg0[%c0, %c0_0] : memref<8x8xf32, #tpu.memory_space<vmem>>, vector<8x8xf32>
    %c0_i32 = arith.constant 0 : i32
    %4 = vector.broadcast %c0_i32 : i32 to vector<8x8xi32>
    %5 = arith.cmpi sle, %2, %4 : vector<8x8xi32>
    %c1_i32 = arith.constant 1 : i32
    %6 = vector.broadcast %c1_i32 : i32 to vector<8x8xi32>
    %7 = arith.cmpi eq, %2, %6 : vector<8x8xi32>
    %c1_i32_1 = arith.constant 1 : i32
    %8 = tpu.dynamic_rotate %3 by %c1_i32_1 dim 1 {stride = 1 : si32, stride_dimension = 0 : si32} : vector<8x8xf32>, i32 -> vector<8x8xf32>
    %9 = vector.extract_strided_slice %8 {offsets = [1, 0], sizes = [7, 8], strides = [1, 1]} : vector<8x8xf32> to vector<7x8xf32>
    %10 = vector.extract_strided_slice %8 {offsets = [0, 0], sizes = [1, 8], strides = [1, 1]} : vector<8x8xf32> to vector<1x8xf32>
    %11 = tpu.concatenate %9, %10 in 0 : vector<7x8xf32>, vector<1x8xf32> -> vector<8x8xf32>
    %cst = arith.constant 0.000000e+00 : f32
    %12 = vector.broadcast %cst : f32 to vector<8x8xf32>
    %13 = arith.select %7, %12, %11 : vector<8x8xi1>, vector<8x8xf32>
    %14 = arith.select %5, %8, %13 : vector<8x8xi1>, vector<8x8xf32>
    %c0_2 = arith.constant 0 : index
    %c0_3 = arith.constant 0 : index
    %15 = vector.load %arg1[%c0_2, %c0_3] : memref<8x8xf32, #tpu.memory_space<vmem>>, vector<8x8xf32>
    tpu.vector_store %arg1[%c0_2, %c0_3], %14 {strides = array<i32>} : memref<8x8xf32, #tpu.memory_space<vmem>>, vector<8x8xf32>,
    return
  }
}

module attributes {stable_mosaic.version = 11 : i64} {
  func.func @_post_attn_kernel(%arg0: i32, %arg1: memref<16x256xbf16, #tpu.memory_space<vmem>>, %arg2: memref<16x128xf32, #tpu.memory_space<vmem>>, %arg3: memref<128x256xbf16, #tpu.memory_space<vmem>>, %arg4: memref<1x128xf32, #tpu.memory_space<vmem>>, %arg5: memref<1x128xf32, #tpu.memory_space<vmem>>, %arg6: memref<256x128xbf16, #tpu.memory_space<vmem>>, %arg7: memref<1x256xf32, #tpu.memory_space<vmem>>, %arg8: memref<128x256xbf16, #tpu.memory_space<vmem>>, %arg9: memref<1x128xf32, #tpu.memory_space<vmem>>, %arg10: memref<1x128xf32, #tpu.memory_space<vmem>>, %arg11: memref<1x128xf32, #tpu.memory_space<vmem>>, %arg12: memref<16x128xf32, #tpu.memory_space<vmem>>) attributes {dimension_semantics = [#tpu.dimension_semantics<parallel>], iteration_bounds = array<i64: 1>, scalar_prefetch = 0 : i64, scratch_operands = 0 : i64, tpu.core_type = #tpu.core_type<tc>, window_params = [{transform_indices = @transform_0, window_bounds = array<i64: 16, 256>}, {transform_indices = @transform_1, window_bounds = array<i64: 16, 128>}, {pipeline_mode = #tpu.pipeline_mode<synchronous>, transform_indices = @transform_2, window_bounds = array<i64: 128, 256>}, {pipeline_mode = #tpu.pipeline_mode<synchronous>, transform_indices = @transform_3, window_bounds = array<i64: 1, 128>}, {pipeline_mode = #tpu.pipeline_mode<synchronous>, transform_indices = @transform_4, window_bounds = array<i64: 1, 128>}, {pipeline_mode = #tpu.pipeline_mode<synchronous>, transform_indices = @transform_5, window_bounds = array<i64: 256, 128>}, {pipeline_mode = #tpu.pipeline_mode<synchronous>, transform_indices = @transform_6, window_bounds = array<i64: 1, 256>}, {pipeline_mode = #tpu.pipeline_mode<synchronous>, transform_indices = @transform_7, window_bounds = array<i64: 128, 256>}, {pipeline_mode = #tpu.pipeline_mode<synchronous>, transform_indices = @transform_8, window_bounds = array<i64: 1, 128>}, {pipeline_mode = #tpu.pipeline_mode<synchronous>, transform_indices = @transform_9, window_bounds = array<i64: 1, 128>}, {pipeline_mode = #tpu.pipeline_mode<synchronous>, transform_indices = @transform_10, window_bounds = array<i64: 1, 128>}, {transform_indices = @transform_11, window_bounds = array<i64: 16, 128>}]} {
    %c0 = arith.constant 0 : index
    %c0_0 = arith.constant 0 : index
    %0 = vector.load %arg1[%c0, %c0_0] : memref<16x256xbf16, #tpu.memory_space<vmem>>, vector<16x256xbf16>
    %c0_1 = arith.constant 0 : index
    %c0_2 = arith.constant 0 : index
    %1 = vector.load %arg3[%c0_1, %c0_2] : memref<128x256xbf16, #tpu.memory_space<vmem>>, vector<128x256xbf16>
    %cst = arith.constant dense<0.000000e+00> : vector<16x128xf32>
    %2 = tpu.matmul %0, %1, %cst {dimension_numbers = #tpu.dot_dimension_numbers<[1], [1], [0], [0], [0, 0, 1, 0], [], []>} : vector<16x256xbf16>, vector<128x256xbf16>, vector<16x128xf32> -> vector<16x128xf32>
    %c0_3 = arith.constant 0 : index
    %c0_4 = arith.constant 0 : index
    %3 = vector.load %arg2[%c0_3, %c0_4] : memref<16x128xf32, #tpu.memory_space<vmem>>, vector<16x128xf32>
    %4 = arith.addf %3, %2 : vector<16x128xf32>
    %c0_5 = arith.constant 0 : index
    %c0_6 = arith.constant 0 : index
    %5 = vector.load %arg4[%c0_5, %c0_6] : memref<1x128xf32, #tpu.memory_space<vmem>>, vector<1x128xf32>
    %c0_7 = arith.constant 0 : index
    %c0_8 = arith.constant 0 : index
    %6 = vector.load %arg5[%c0_7, %c0_8] : memref<1x128xf32, #tpu.memory_space<vmem>>, vector<1x128xf32>
    %cst_9 = arith.constant dense<0.000000e+00> : vector<16xf32>
    %7 = vector.multi_reduction <add>, %4, %cst_9 [1] : vector<16x128xf32> to vector<16xf32>
    %8 = vector.shape_cast %7 : vector<16xf32> to vector<16x1xf32>
    %cst_10 = arith.constant 1.280000e+02 : f32
    %9 = vector.broadcast %cst_10 : f32 to vector<16x1xf32>
    %10 = arith.divf %8, %9 : vector<16x1xf32>
    %11 = arith.mulf %4, %4 : vector<16x128xf32>
    %cst_11 = arith.constant dense<0.000000e+00> : vector<16xf32>
    %12 = vector.multi_reduction <add>, %11, %cst_11 [1] : vector<16x128xf32> to vector<16xf32>
    %13 = vector.shape_cast %12 : vector<16xf32> to vector<16x1xf32>
    %cst_12 = arith.constant 1.280000e+02 : f32
    %14 = vector.broadcast %cst_12 : f32 to vector<16x1xf32>
    %15 = arith.divf %13, %14 : vector<16x1xf32>
    %16 = arith.mulf %10, %10 : vector<16x1xf32>
    %17 = arith.subf %15, %16 : vector<16x1xf32>
    %cst_13 = arith.constant 0.000000e+00 : f32
    %18 = vector.broadcast %cst_13 : f32 to vector<16x1xf32>
    %19 = arith.maximumf %17, %18 : vector<16x1xf32>
    %20 = vector.broadcast %10 : vector<16x1xf32> to vector<16x128xf32>
    %21 = arith.subf %4, %20 : vector<16x128xf32>
    %cst_14 = arith.constant 9.99999974E-6 : f32
    %22 = vector.broadcast %cst_14 : f32 to vector<16x1xf32>
    %23 = arith.addf %19, %22 : vector<16x1xf32>
    %24 = math.rsqrt %23 : vector<16x1xf32>
    %25 = vector.broadcast %24 : vector<16x1xf32> to vector<16x128xf32>
    %26 = arith.mulf %21, %25 : vector<16x128xf32>
    %27 = vector.broadcast %5 : vector<1x128xf32> to vector<16x128xf32>
    %28 = arith.mulf %26, %27 : vector<16x128xf32>
    %29 = vector.broadcast %6 : vector<1x128xf32> to vector<16x128xf32>
    %30 = arith.addf %28, %29 : vector<16x128xf32>
    %31 = arith.truncf %30 : vector<16x128xf32> to vector<16x128xbf16>
    %c0_15 = arith.constant 0 : index
    %c0_16 = arith.constant 0 : index
    %32 = vector.load %arg6[%c0_15, %c0_16] : memref<256x128xbf16, #tpu.memory_space<vmem>>, vector<256x128xbf16>
    %cst_17 = arith.constant dense<0.000000e+00> : vector<16x256xf32>
    %33 = tpu.matmul %31, %32, %cst_17 {dimension_numbers = #tpu.dot_dimension_numbers<[1], [1], [0], [0], [0, 0, 1, 0], [], []>} : vector<16x128xbf16>, vector<256x128xbf16>, vector<16x256xf32> -> vector<16x256xf32>
    %c0_18 = arith.constant 0 : index
    %c0_19 = arith.constant 0 : index
    %34 = vector.load %arg7[%c0_18, %c0_19] : memref<1x256xf32, #tpu.memory_space<vmem>>, vector<1x256xf32>
    %35 = vector.broadcast %34 : vector<1x256xf32> to vector<16x256xf32>
    %36 = arith.addf %33, %35 : vector<16x256xf32>
    %cst_20 = arith.constant 0.000000e+00 : f32
    %37 = vector.broadcast %cst_20 : f32 to vector<16x256xf32>
    %38 = arith.maximumf %36, %37 : vector<16x256xf32>
    %39 = arith.truncf %38 : vector<16x256xf32> to vector<16x256xbf16>
    %c0_21 = arith.constant 0 : index
    %c0_22 = arith.constant 0 : index
    %40 = vector.load %arg8[%c0_21, %c0_22] : memref<128x256xbf16, #tpu.memory_space<vmem>>, vector<128x256xbf16>
    %cst_23 = arith.constant dense<0.000000e+00> : vector<16x128xf32>
    %41 = tpu.matmul %39, %40, %cst_23 {dimension_numbers = #tpu.dot_dimension_numbers<[1], [1], [0], [0], [0, 0, 1, 0], [], []>} : vector<16x256xbf16>, vector<128x256xbf16>, vector<16x128xf32> -> vector<16x128xf32>
    %c0_24 = arith.constant 0 : index
    %c0_25 = arith.constant 0 : index
    %42 = vector.load %arg9[%c0_24, %c0_25] : memref<1x128xf32, #tpu.memory_space<vmem>>, vector<1x128xf32>
    %43 = vector.broadcast %42 : vector<1x128xf32> to vector<16x128xf32>
    %44 = arith.addf %41, %43 : vector<16x128xf32>
    %45 = arith.addf %30, %44 : vector<16x128xf32>
    %c0_26 = arith.constant 0 : index
    %c0_27 = arith.constant 0 : index
    %46 = vector.load %arg10[%c0_26, %c0_27] : memref<1x128xf32, #tpu.memory_space<vmem>>, vector<1x128xf32>
    %c0_28 = arith.constant 0 : index
    %c0_29 = arith.constant 0 : index
    %47 = vector.load %arg11[%c0_28, %c0_29] : memref<1x128xf32, #tpu.memory_space<vmem>>, vector<1x128xf32>
    %cst_30 = arith.constant dense<0.000000e+00> : vector<16xf32>
    %48 = vector.multi_reduction <add>, %45, %cst_30 [1] : vector<16x128xf32> to vector<16xf32>
    %49 = vector.shape_cast %48 : vector<16xf32> to vector<16x1xf32>
    %cst_31 = arith.constant 1.280000e+02 : f32
    %50 = vector.broadcast %cst_31 : f32 to vector<16x1xf32>
    %51 = arith.divf %49, %50 : vector<16x1xf32>
    %52 = arith.mulf %45, %45 : vector<16x128xf32>
    %cst_32 = arith.constant dense<0.000000e+00> : vector<16xf32>
    %53 = vector.multi_reduction <add>, %52, %cst_32 [1] : vector<16x128xf32> to vector<16xf32>
    %54 = vector.shape_cast %53 : vector<16xf32> to vector<16x1xf32>
    %cst_33 = arith.constant 1.280000e+02 : f32
    %55 = vector.broadcast %cst_33 : f32 to vector<16x1xf32>
    %56 = arith.divf %54, %55 : vector<16x1xf32>
    %57 = arith.mulf %51, %51 : vector<16x1xf32>
    %58 = arith.subf %56, %57 : vector<16x1xf32>
    %cst_34 = arith.constant 0.000000e+00 : f32
    %59 = vector.broadcast %cst_34 : f32 to vector<16x1xf32>
    %60 = arith.maximumf %58, %59 : vector<16x1xf32>
    %61 = vector.broadcast %51 : vector<16x1xf32> to vector<16x128xf32>
    %62 = arith.subf %45, %61 : vector<16x128xf32>
    %cst_35 = arith.constant 9.99999974E-6 : f32
    %63 = vector.broadcast %cst_35 : f32 to vector<16x1xf32>
    %64 = arith.addf %60, %63 : vector<16x1xf32>
    %65 = math.rsqrt %64 : vector<16x1xf32>
    %66 = vector.broadcast %65 : vector<16x1xf32> to vector<16x128xf32>
    %67 = arith.mulf %62, %66 : vector<16x128xf32>
    %68 = vector.broadcast %46 : vector<1x128xf32> to vector<16x128xf32>
    %69 = arith.mulf %67, %68 : vector<16x128xf32>
    %70 = vector.broadcast %47 : vector<1x128xf32> to vector<16x128xf32>
    %71 = arith.addf %69, %70 : vector<16x128xf32>
    %c0_36 = arith.constant 0 : index
    %c0_37 = arith.constant 0 : index
    %72 = vector.load %arg12[%c0_36, %c0_37] : memref<16x128xf32, #tpu.memory_space<vmem>>, vector<16x128xf32>
    tpu.vector_store %arg12[%c0_36, %c0_37], %71 {strides = array<i32>} : memref<16x128xf32, #tpu.memory_space<vmem>>, vector<16x128xf32>,
    return
  }
  func.func @transform_0(%arg0: i32) -> (i32, i32) {
    %c0_i32 = arith.constant 0 : i32
    %c0_i32_0 = arith.constant 0 : i32
    return %arg0, %c0_i32 : i32, i32
  }
  func.func @transform_1(%arg0: i32) -> (i32, i32) {
    %c0_i32 = arith.constant 0 : i32
    %c0_i32_0 = arith.constant 0 : i32
    return %arg0, %c0_i32 : i32, i32
  }
  func.func @transform_2(%arg0: i32) -> (i32, i32) {
    %c0_i32 = arith.constant 0 : i32
    %c0_i32_0 = arith.constant 0 : i32
    %c0_i32_1 = arith.constant 0 : i32
    return %c0_i32, %c0_i32_0 : i32, i32
  }
  func.func @transform_3(%arg0: i32) -> (i32, i32) {
    %c0_i32 = arith.constant 0 : i32
    %c0_i32_0 = arith.constant 0 : i32
    %c0_i32_1 = arith.constant 0 : i32
    return %c0_i32, %c0_i32_0 : i32, i32
  }
  func.func @transform_4(%arg0: i32) -> (i32, i32) {
    %c0_i32 = arith.constant 0 : i32
    %c0_i32_0 = arith.constant 0 : i32
    %c0_i32_1 = arith.constant 0 : i32
    return %c0_i32, %c0_i32_0 : i32, i32
  }
  func.func @transform_5(%arg0: i32) -> (i32, i32) {
    %c0_i32 = arith.constant 0 : i32
    %c0_i32_0 = arith.constant 0 : i32
    %c0_i32_1 = arith.constant 0 : i32
    return %c0_i32, %c0_i32_0 : i32, i32
  }
  func.func @transform_6(%arg0: i32) -> (i32, i32) {
    %c0_i32 = arith.constant 0 : i32
    %c0_i32_0 = arith.constant 0 : i32
    %c0_i32_1 = arith.constant 0 : i32
    return %c0_i32, %c0_i32_0 : i32, i32
  }
  func.func @transform_7(%arg0: i32) -> (i32, i32) {
    %c0_i32 = arith.constant 0 : i32
    %c0_i32_0 = arith.constant 0 : i32
    %c0_i32_1 = arith.constant 0 : i32
    return %c0_i32, %c0_i32_0 : i32, i32
  }
  func.func @transform_8(%arg0: i32) -> (i32, i32) {
    %c0_i32 = arith.constant 0 : i32
    %c0_i32_0 = arith.constant 0 : i32
    %c0_i32_1 = arith.constant 0 : i32
    return %c0_i32, %c0_i32_0 : i32, i32
  }
  func.func @transform_9(%arg0: i32) -> (i32, i32) {
    %c0_i32 = arith.constant 0 : i32
    %c0_i32_0 = arith.constant 0 : i32
    %c0_i32_1 = arith.constant 0 : i32
    return %c0_i32, %c0_i32_0 : i32, i32
  }
  func.func @transform_10(%arg0: i32) -> (i32, i32) {
    %c0_i32 = arith.constant 0 : i32
    %c0_i32_0 = arith.constant 0 : i32
    %c0_i32_1 = arith.constant 0 : i32
    return %c0_i32, %c0_i32_0 : i32, i32
  }
  func.func @transform_11(%arg0: i32) -> (i32, i32) {
    %c0_i32 = arith.constant 0 : i32
    %c0_i32_0 = arith.constant 0 : i32
    return %arg0, %c0_i32 : i32, i32
  }
}

module attributes {stable_mosaic.version = 11 : i64} {
  func.func @_fused_attn_kernel(%arg0: i32, %arg1: i32, %arg2: memref<1x8x128xf32, #tpu.memory_space<vmem>>, %arg3: memref<128x128xbf16, #tpu.memory_space<vmem>>, %arg4: memref<128x128xbf16, #tpu.memory_space<vmem>>, %arg5: memref<128x128xbf16, #tpu.memory_space<vmem>>, %arg6: memref<8x128xbf16, #tpu.memory_space<vmem>>, %arg7: memref<2x128xbf16, #tpu.memory_space<vmem>>, %arg8: memref<1x8x128xbf16, #tpu.memory_space<vmem>>) attributes {dimension_semantics = [#tpu.dimension_semantics<parallel>, #tpu.dimension_semantics<parallel>], iteration_bounds = array<i64: 2, 2>, scalar_prefetch = 0 : i64, scratch_operands = 0 : i64, tpu.core_type = #tpu.core_type<tc>, window_params = [{transform_indices = @transform_0, window_bounds = array<i64: 1, 8, 128>}, {transform_indices = @transform_1, window_bounds = array<i64: 128, 128>}, {transform_indices = @transform_2, window_bounds = array<i64: 128, 128>}, {transform_indices = @transform_3, window_bounds = array<i64: 128, 128>}, {transform_indices = @transform_4, window_bounds = array<i64: 8, 128>}, {transform_indices = @transform_5, window_bounds = array<i64: 2, 128>}, {transform_indices = @transform_6, window_bounds = array<i64: 1, 8, 128>}]} {
    %c0 = arith.constant 0 : index
    %c0_0 = arith.constant 0 : index
    %c0_1 = arith.constant 0 : index
    %0 = vector.load %arg2[%c0, %c0_0, %c0_1] : memref<1x8x128xf32, #tpu.memory_space<vmem>>, vector<1x8x128xf32>
    %1 = vector.shape_cast %0 : vector<1x8x128xf32> to vector<8x128xf32>
    %2 = arith.truncf %1 : vector<8x128xf32> to vector<8x128xbf16>
    %c0_2 = arith.constant 0 : index
    %c0_3 = arith.constant 0 : index
    %3 = vector.load %arg3[%c0_2, %c0_3] : memref<128x128xbf16, #tpu.memory_space<vmem>>, vector<128x128xbf16>
    %cst = arith.constant dense<0.000000e+00> : vector<8x128xf32>
    %4 = tpu.matmul %2, %3, %cst {dimension_numbers = #tpu.dot_dimension_numbers<[1], [1], [0], [0], [0, 0, 1, 0], [], []>} : vector<8x128xbf16>, vector<128x128xbf16>, vector<8x128xf32> -> vector<8x128xf32>
    %5 = arith.truncf %4 : vector<8x128xf32> to vector<8x128xbf16>
    %c0_4 = arith.constant 0 : index
    %c0_5 = arith.constant 0 : index
    %6 = vector.load %arg4[%c0_4, %c0_5] : memref<128x128xbf16, #tpu.memory_space<vmem>>, vector<128x128xbf16>
    %cst_6 = arith.constant dense<0.000000e+00> : vector<8x128xf32>
    %7 = tpu.matmul %2, %6, %cst_6 {dimension_numbers = #tpu.dot_dimension_numbers<[1], [1], [0], [0], [0, 0, 1, 0], [], []>} : vector<8x128xbf16>, vector<128x128xbf16>, vector<8x128xf32> -> vector<8x128xf32>
    %8 = arith.truncf %7 : vector<8x128xf32> to vector<8x128xbf16>
    %c0_7 = arith.constant 0 : index
    %c0_8 = arith.constant 0 : index
    %9 = vector.load %arg5[%c0_7, %c0_8] : memref<128x128xbf16, #tpu.memory_space<vmem>>, vector<128x128xbf16>
    %cst_9 = arith.constant dense<0.000000e+00> : vector<8x128xf32>
    %10 = tpu.matmul %2, %9, %cst_9 {dimension_numbers = #tpu.dot_dimension_numbers<[1], [1], [0], [0], [0, 0, 1, 0], [], []>} : vector<8x128xbf16>, vector<128x128xbf16>, vector<8x128xf32> -> vector<8x128xf32>
    %11 = arith.truncf %10 : vector<8x128xf32> to vector<8x128xbf16>
    %c0_10 = arith.constant 0 : index
    %c0_11 = arith.constant 0 : index
    %12 = vector.load %arg6[%c0_10, %c0_11] : memref<8x128xbf16, #tpu.memory_space<vmem>>, vector<8x128xbf16>
    %13 = tpu.concatenate %8, %12 in 0 : vector<8x128xbf16>, vector<8x128xbf16> -> vector<16x128xbf16>
    %c0_12 = arith.constant 0 : index
    %c0_13 = arith.constant 0 : index
    %14 = vector.load %arg7[%c0_12, %c0_13] : memref<2x128xbf16, #tpu.memory_space<vmem>>, vector<2x128xbf16>
    %15 = tpu.iota {dimensions = array<i32: 0>} : vector<8x8xi32>
    %16 = tpu.iota {dimensions = array<i32: 1>} : vector<8x8xi32>
    %17 = arith.subi %16, %15 : vector<8x8xi32>
    %c0_i32 = arith.constant 0 : i32
    %18 = vector.broadcast %c0_i32 : i32 to vector<8x8xi32>
    %19 = arith.cmpi sle, %17, %18 : vector<8x8xi32>
    %c1_i32 = arith.constant 1 : i32
    %20 = vector.broadcast %c1_i32 : i32 to vector<8x8xi32>
    %21 = arith.cmpi eq, %17, %20 : vector<8x8xi32>
    %c7_i32 = arith.constant 7 : i32
    %22 = vector.broadcast %c7_i32 : i32 to vector<8x8xi32>
    %23 = arith.subi %22, %15 : vector<8x8xi32>
    %24 = vector.extract_strided_slice %5 {offsets = [0, 0], sizes = [8, 32], strides = [1, 1]} : vector<8x128xbf16> to vector<8x32xbf16>
    %25 = vector.extract_strided_slice %13 {offsets = [0, 0], sizes = [16, 32], strides = [1, 1]} : vector<16x128xbf16> to vector<16x32xbf16>
    %26 = vector.extract_strided_slice %11 {offsets = [0, 0], sizes = [8, 32], strides = [1, 1]} : vector<8x128xbf16> to vector<8x32xbf16>
    %cst_14 = arith.constant dense<0.000000e+00> : vector<8x16xf32>
    %27 = tpu.matmul %24, %25, %cst_14 {dimension_numbers = #tpu.dot_dimension_numbers<[1], [1], [0], [0], [0, 0, 1, 0], [], []>} : vector<8x32xbf16>, vector<16x32xbf16>, vector<8x16xf32> -> vector<8x16xf32>
    %28 = vector.extract_strided_slice %14 {offsets = [0, 0], sizes = [2, 32], strides = [1, 1]} : vector<2x128xbf16> to vector<2x32xbf16>
    %cst_15 = arith.constant dense<0.000000e+00> : vector<2x16xf32>
    %29 = tpu.matmul %28, %25, %cst_15 {dimension_numbers = #tpu.dot_dimension_numbers<[1], [1], [0], [0], [0, 0, 1, 0], [], []>} : vector<2x32xbf16>, vector<16x32xbf16>, vector<2x16xf32> -> vector<2x16xf32>
    %30 = vector.extract_strided_slice %27 {offsets = [0, 0], sizes = [8, 8], strides = [1, 1]} : vector<8x16xf32> to vector<8x8xf32>
    %31 = vector.extract_strided_slice %29 {offsets = [0, 0], sizes = [1, 8], strides = [1, 1]} : vector<2x16xf32> to vector<1x8xf32>
    %32 = vector.broadcast %31 : vector<1x8xf32> to vector<8x8xf32>
    %33 = arith.addf %30, %32 : vector<8x8xf32>
    %34 = vector.extract_strided_slice %27 {offsets = [0, 8], sizes = [8, 8], strides = [1, 1]} : vector<8x16xf32> to vector<8x8xf32>
    %35 = vector.extract_strided_slice %29 {offsets = [1, 8], sizes = [1, 8], strides = [1, 1]} : vector<2x16xf32> to vector<1x8xf32>
    %36 = vector.broadcast %35 : vector<1x8xf32> to vector<8x8xf32>
    %37 = arith.addf %34, %36 : vector<8x8xf32>
    %38 = vector.extract_strided_slice %37 {offsets = [0, 1], sizes = [8, 7], strides = [1, 1]} : vector<8x8xf32> to vector<8x7xf32>
    %39 = vector.extract_strided_slice %37 {offsets = [0, 0], sizes = [8, 1], strides = [1, 1]} : vector<8x8xf32> to vector<8x1xf32>
    %40 = tpu.concatenate %38, %39 in 1 : vector<8x7xf32>, vector<8x1xf32> -> vector<8x8xf32>
    %c0_i32_16 = arith.constant 0 : i32
    %41 = vector.broadcast %c0_i32_16 : i32 to vector<8x8xi32>
    %42 = arith.shrsi %23, %41 : vector<8x8xi32>
    %c1_i32_17 = arith.constant 1 : i32
    %43 = vector.broadcast %c1_i32_17 : i32 to vector<8x8xi32>
    %44 = arith.andi %42, %43 : vector<8x8xi32>
    %c1_i32_18 = arith.constant 1 : i32
    %45 = vector.broadcast %c1_i32_18 : i32 to vector<8x8xi32>
    %46 = arith.cmpi eq, %44, %45 : vector<8x8xi32>
    %47 = arith.select %46, %40, %37 : vector<8x8xi1>, vector<8x8xf32>
    %48 = vector.extract_strided_slice %47 {offsets = [0, 2], sizes = [8, 6], strides = [1, 1]} : vector<8x8xf32> to vector<8x6xf32>
    %49 = vector.extract_strided_slice %47 {offsets = [0, 0], sizes = [8, 2], strides = [1, 1]} : vector<8x8xf32> to vector<8x2xf32>
    %50 = tpu.concatenate %48, %49 in 1 : vector<8x6xf32>, vector<8x2xf32> -> vector<8x8xf32>
    %c1_i32_19 = arith.constant 1 : i32
    %51 = vector.broadcast %c1_i32_19 : i32 to vector<8x8xi32>
    %52 = arith.shrsi %23, %51 : vector<8x8xi32>
    %c1_i32_20 = arith.constant 1 : i32
    %53 = vector.broadcast %c1_i32_20 : i32 to vector<8x8xi32>
    %54 = arith.andi %52, %53 : vector<8x8xi32>
    %c1_i32_21 = arith.constant 1 : i32
    %55 = vector.broadcast %c1_i32_21 : i32 to vector<8x8xi32>
    %56 = arith.cmpi eq, %54, %55 : vector<8x8xi32>
    %57 = arith.select %56, %50, %47 : vector<8x8xi1>, vector<8x8xf32>
    %58 = vector.extract_strided_slice %57 {offsets = [0, 4], sizes = [8, 4], strides = [1, 1]} : vector<8x8xf32> to vector<8x4xf32>
    %59 = vector.extract_strided_slice %57 {offsets = [0, 0], sizes = [8, 4], strides = [1, 1]} : vector<8x8xf32> to vector<8x4xf32>
    %60 = tpu.concatenate %58, %59 in 1 : vector<8x4xf32>, vector<8x4xf32> -> vector<8x8xf32>
    %c2_i32 = arith.constant 2 : i32
    %61 = vector.broadcast %c2_i32 : i32 to vector<8x8xi32>
    %62 = arith.shrsi %23, %61 : vector<8x8xi32>
    %c1_i32_22 = arith.constant 1 : i32
    %63 = vector.broadcast %c1_i32_22 : i32 to vector<8x8xi32>
    %64 = arith.andi %62, %63 : vector<8x8xi32>
    %c1_i32_23 = arith.constant 1 : i32
    %65 = vector.broadcast %c1_i32_23 : i32 to vector<8x8xi32>
    %66 = arith.cmpi eq, %64, %65 : vector<8x8xi32>
    %67 = arith.select %66, %60, %57 : vector<8x8xi1>, vector<8x8xf32>
    %68 = vector.extract_strided_slice %67 {offsets = [1, 0], sizes = [7, 8], strides = [1, 1]} : vector<8x8xf32> to vector<7x8xf32>
    %69 = vector.extract_strided_slice %67 {offsets = [0, 0], sizes = [1, 8], strides = [1, 1]} : vector<8x8xf32> to vector<1x8xf32>
    %70 = tpu.concatenate %68, %69 in 0 : vector<7x8xf32>, vector<1x8xf32> -> vector<8x8xf32>
    %cst_24 = arith.constant 0.000000e+00 : f32
    %71 = vector.broadcast %cst_24 : f32 to vector<8x8xf32>
    %72 = arith.select %21, %71, %70 : vector<8x8xi1>, vector<8x8xf32>
    %73 = arith.select %19, %67, %72 : vector<8x8xi1>, vector<8x8xf32>
    %74 = arith.addf %33, %73 : vector<8x8xf32>
    %cst_25 = arith.constant dense<0xFF800000> : vector<8xf32>
    %75 = vector.multi_reduction <maximumf>, %74, %cst_25 [1] : vector<8x8xf32> to vector<8xf32>
    %76 = vector.shape_cast %75 : vector<8xf32> to vector<8x1xf32>
    %77 = vector.broadcast %76 : vector<8x1xf32> to vector<8x8xf32>
    %78 = arith.subf %74, %77 : vector<8x8xf32>
    %79 = math.exp %78 : vector<8x8xf32>
    %cst_26 = arith.constant dense<0.000000e+00> : vector<8xf32>
    %80 = vector.multi_reduction <add>, %79, %cst_26 [1] : vector<8x8xf32> to vector<8xf32>
    %81 = vector.shape_cast %80 : vector<8xf32> to vector<8x1xf32>
    %82 = tpu.reciprocal %81 {approx = true} : vector<8x1xf32> -> vector<8x1xf32>
    %83 = vector.broadcast %82 : vector<8x1xf32> to vector<8x8xf32>
    %84 = arith.mulf %79, %83 : vector<8x8xf32>
    %85 = arith.truncf %84 : vector<8x8xf32> to vector<8x8xbf16>
    %cst_27 = arith.constant dense<0.000000e+00> : vector<8x32xf32>
    %86 = tpu.matmul %85, %26, %cst_27 {dimension_numbers = #tpu.dot_dimension_numbers<[1], [0], [0], [1], [0, 0, 1, 1], [], []>} : vector<8x8xbf16>, vector<8x32xbf16>, vector<8x32xf32> -> vector<8x32xf32>
    %87 = arith.truncf %86 : vector<8x32xf32> to vector<8x32xbf16>
    %c0_28 = arith.constant 0 : index
    %c0_29 = arith.constant 0 : index
    %c0_30 = arith.constant 0 : index
    %88 = vector.load %arg8[%c0_28, %c0_29, %c0_30] : memref<1x8x128xbf16, #tpu.memory_space<vmem>>, vector<1x8x32xbf16>
    %89 = vector.shape_cast %88 : vector<1x8x32xbf16> to vector<8x32xbf16>
    %90 = vector.shape_cast %87 : vector<8x32xbf16> to vector<1x8x32xbf16>
    tpu.vector_store %arg8[%c0_28, %c0_29, %c0_30], %90 {strides = array<i32>} : memref<1x8x128xbf16, #tpu.memory_space<vmem>>, vector<1x8x32xbf16>,
    %91 = vector.extract_strided_slice %5 {offsets = [0, 32], sizes = [8, 32], strides = [1, 1]} : vector<8x128xbf16> to vector<8x32xbf16>
    %92 = vector.extract_strided_slice %13 {offsets = [0, 32], sizes = [16, 32], strides = [1, 1]} : vector<16x128xbf16> to vector<16x32xbf16>
    %93 = vector.extract_strided_slice %11 {offsets = [0, 32], sizes = [8, 32], strides = [1, 1]} : vector<8x128xbf16> to vector<8x32xbf16>
    %cst_31 = arith.constant dense<0.000000e+00> : vector<8x16xf32>
    %94 = tpu.matmul %91, %92, %cst_31 {dimension_numbers = #tpu.dot_dimension_numbers<[1], [1], [0], [0], [0, 0, 1, 0], [], []>} : vector<8x32xbf16>, vector<16x32xbf16>, vector<8x16xf32> -> vector<8x16xf32>
    %95 = vector.extract_strided_slice %14 {offsets = [0, 32], sizes = [2, 32], strides = [1, 1]} : vector<2x128xbf16> to vector<2x32xbf16>
    %cst_32 = arith.constant dense<0.000000e+00> : vector<2x16xf32>
    %96 = tpu.matmul %95, %92, %cst_32 {dimension_numbers = #tpu.dot_dimension_numbers<[1], [1], [0], [0], [0, 0, 1, 0], [], []>} : vector<2x32xbf16>, vector<16x32xbf16>, vector<2x16xf32> -> vector<2x16xf32>
    %97 = vector.extract_strided_slice %94 {offsets = [0, 0], sizes = [8, 8], strides = [1, 1]} : vector<8x16xf32> to vector<8x8xf32>
    %98 = vector.extract_strided_slice %96 {offsets = [0, 0], sizes = [1, 8], strides = [1, 1]} : vector<2x16xf32> to vector<1x8xf32>
    %99 = vector.broadcast %98 : vector<1x8xf32> to vector<8x8xf32>
    %100 = arith.addf %97, %99 : vector<8x8xf32>
    %101 = vector.extract_strided_slice %94 {offsets = [0, 8], sizes = [8, 8], strides = [1, 1]} : vector<8x16xf32> to vector<8x8xf32>
    %102 = vector.extract_strided_slice %96 {offsets = [1, 8], sizes = [1, 8], strides = [1, 1]} : vector<2x16xf32> to vector<1x8xf32>
    %103 = vector.broadcast %102 : vector<1x8xf32> to vector<8x8xf32>
    %104 = arith.addf %101, %103 : vector<8x8xf32>
    %105 = vector.extract_strided_slice %104 {offsets = [0, 1], sizes = [8, 7], strides = [1, 1]} : vector<8x8xf32> to vector<8x7xf32>
    %106 = vector.extract_strided_slice %104 {offsets = [0, 0], sizes = [8, 1], strides = [1, 1]} : vector<8x8xf32> to vector<8x1xf32>
    %107 = tpu.concatenate %105, %106 in 1 : vector<8x7xf32>, vector<8x1xf32> -> vector<8x8xf32>
    %c0_i32_33 = arith.constant 0 : i32
    %108 = vector.broadcast %c0_i32_33 : i32 to vector<8x8xi32>
    %109 = arith.shrsi %23, %108 : vector<8x8xi32>
    %c1_i32_34 = arith.constant 1 : i32
    %110 = vector.broadcast %c1_i32_34 : i32 to vector<8x8xi32>
    %111 = arith.andi %109, %110 : vector<8x8xi32>
    %c1_i32_35 = arith.constant 1 : i32
    %112 = vector.broadcast %c1_i32_35 : i32 to vector<8x8xi32>
    %113 = arith.cmpi eq, %111, %112 : vector<8x8xi32>
    %114 = arith.select %113, %107, %104 : vector<8x8xi1>, vector<8x8xf32>
    %115 = vector.extract_strided_slice %114 {offsets = [0, 2], sizes = [8, 6], strides = [1, 1]} : vector<8x8xf32> to vector<8x6xf32>
    %116 = vector.extract_strided_slice %114 {offsets = [0, 0], sizes = [8, 2], strides = [1, 1]} : vector<8x8xf32> to vector<8x2xf32>
    %117 = tpu.concatenate %115, %116 in 1 : vector<8x6xf32>, vector<8x2xf32> -> vector<8x8xf32>
    %c1_i32_36 = arith.constant 1 : i32
    %118 = vector.broadcast %c1_i32_36 : i32 to vector<8x8xi32>
    %119 = arith.shrsi %23, %118 : vector<8x8xi32>
    %c1_i32_37 = arith.constant 1 : i32
    %120 = vector.broadcast %c1_i32_37 : i32 to vector<8x8xi32>
    %121 = arith.andi %119, %120 : vector<8x8xi32>
    %c1_i32_38 = arith.constant 1 : i32
    %122 = vector.broadcast %c1_i32_38 : i32 to vector<8x8xi32>
    %123 = arith.cmpi eq, %121, %122 : vector<8x8xi32>
    %124 = arith.select %123, %117, %114 : vector<8x8xi1>, vector<8x8xf32>
    %125 = vector.extract_strided_slice %124 {offsets = [0, 4], sizes = [8, 4], strides = [1, 1]} : vector<8x8xf32> to vector<8x4xf32>
    %126 = vector.extract_strided_slice %124 {offsets = [0, 0], sizes = [8, 4], strides = [1, 1]} : vector<8x8xf32> to vector<8x4xf32>
    %127 = tpu.concatenate %125, %126 in 1 : vector<8x4xf32>, vector<8x4xf32> -> vector<8x8xf32>
    %c2_i32_39 = arith.constant 2 : i32
    %128 = vector.broadcast %c2_i32_39 : i32 to vector<8x8xi32>
    %129 = arith.shrsi %23, %128 : vector<8x8xi32>
    %c1_i32_40 = arith.constant 1 : i32
    %130 = vector.broadcast %c1_i32_40 : i32 to vector<8x8xi32>
    %131 = arith.andi %129, %130 : vector<8x8xi32>
    %c1_i32_41 = arith.constant 1 : i32
    %132 = vector.broadcast %c1_i32_41 : i32 to vector<8x8xi32>
    %133 = arith.cmpi eq, %131, %132 : vector<8x8xi32>
    %134 = arith.select %133, %127, %124 : vector<8x8xi1>, vector<8x8xf32>
    %135 = vector.extract_strided_slice %134 {offsets = [1, 0], sizes = [7, 8], strides = [1, 1]} : vector<8x8xf32> to vector<7x8xf32>
    %136 = vector.extract_strided_slice %134 {offsets = [0, 0], sizes = [1, 8], strides = [1, 1]} : vector<8x8xf32> to vector<1x8xf32>
    %137 = tpu.concatenate %135, %136 in 0 : vector<7x8xf32>, vector<1x8xf32> -> vector<8x8xf32>
    %cst_42 = arith.constant 0.000000e+00 : f32
    %138 = vector.broadcast %cst_42 : f32 to vector<8x8xf32>
    %139 = arith.select %21, %138, %137 : vector<8x8xi1>, vector<8x8xf32>
    %140 = arith.select %19, %134, %139 : vector<8x8xi1>, vector<8x8xf32>
    %141 = arith.addf %100, %140 : vector<8x8xf32>
    %cst_43 = arith.constant dense<0xFF800000> : vector<8xf32>
    %142 = vector.multi_reduction <maximumf>, %141, %cst_43 [1] : vector<8x8xf32> to vector<8xf32>
    %143 = vector.shape_cast %142 : vector<8xf32> to vector<8x1xf32>
    %144 = vector.broadcast %143 : vector<8x1xf32> to vector<8x8xf32>
    %145 = arith.subf %141, %144 : vector<8x8xf32>
    %146 = math.exp %145 : vector<8x8xf32>
    %cst_44 = arith.constant dense<0.000000e+00> : vector<8xf32>
    %147 = vector.multi_reduction <add>, %146, %cst_44 [1] : vector<8x8xf32> to vector<8xf32>
    %148 = vector.shape_cast %147 : vector<8xf32> to vector<8x1xf32>
    %149 = tpu.reciprocal %148 {approx = true} : vector<8x1xf32> -> vector<8x1xf32>
    %150 = vector.broadcast %149 : vector<8x1xf32> to vector<8x8xf32>
    %151 = arith.mulf %146, %150 : vector<8x8xf32>
    %152 = arith.truncf %151 : vector<8x8xf32> to vector<8x8xbf16>
    %cst_45 = arith.constant dense<0.000000e+00> : vector<8x32xf32>
    %153 = tpu.matmul %152, %93, %cst_45 {dimension_numbers = #tpu.dot_dimension_numbers<[1], [0], [0], [1], [0, 0, 1, 1], [], []>} : vector<8x8xbf16>, vector<8x32xbf16>, vector<8x32xf32> -> vector<8x32xf32>
    %154 = arith.truncf %153 : vector<8x32xf32> to vector<8x32xbf16>
    %c0_46 = arith.constant 0 : index
    %c0_47 = arith.constant 0 : index
    %c32 = arith.constant 32 : index
    %155 = vector.load %arg8[%c0_46, %c0_47, %c32] : memref<1x8x128xbf16, #tpu.memory_space<vmem>>, vector<1x8x32xbf16>
    %156 = vector.shape_cast %155 : vector<1x8x32xbf16> to vector<8x32xbf16>
    %157 = vector.shape_cast %154 : vector<8x32xbf16> to vector<1x8x32xbf16>
    tpu.vector_store %arg8[%c0_46, %c0_47, %c32], %157 {strides = array<i32>} : memref<1x8x128xbf16, #tpu.memory_space<vmem>>, vector<1x8x32xbf16>,
    %158 = vector.extract_strided_slice %5 {offsets = [0, 64], sizes = [8, 32], strides = [1, 1]} : vector<8x128xbf16> to vector<8x32xbf16>
    %159 = vector.extract_strided_slice %13 {offsets = [0, 64], sizes = [16, 32], strides = [1, 1]} : vector<16x128xbf16> to vector<16x32xbf16>
    %160 = vector.extract_strided_slice %11 {offsets = [0, 64], sizes = [8, 32], strides = [1, 1]} : vector<8x128xbf16> to vector<8x32xbf16>
    %cst_48 = arith.constant dense<0.000000e+00> : vector<8x16xf32>
    %161 = tpu.matmul %158, %159, %cst_48 {dimension_numbers = #tpu.dot_dimension_numbers<[1], [1], [0], [0], [0, 0, 1, 0], [], []>} : vector<8x32xbf16>, vector<16x32xbf16>, vector<8x16xf32> -> vector<8x16xf32>
    %162 = vector.extract_strided_slice %14 {offsets = [0, 64], sizes = [2, 32], strides = [1, 1]} : vector<2x128xbf16> to vector<2x32xbf16>
    %cst_49 = arith.constant dense<0.000000e+00> : vector<2x16xf32>
    %163 = tpu.matmul %162, %159, %cst_49 {dimension_numbers = #tpu.dot_dimension_numbers<[1], [1], [0], [0], [0, 0, 1, 0], [], []>} : vector<2x32xbf16>, vector<16x32xbf16>, vector<2x16xf32> -> vector<2x16xf32>
    %164 = vector.extract_strided_slice %161 {offsets = [0, 0], sizes = [8, 8], strides = [1, 1]} : vector<8x16xf32> to vector<8x8xf32>
    %165 = vector.extract_strided_slice %163 {offsets = [0, 0], sizes = [1, 8], strides = [1, 1]} : vector<2x16xf32> to vector<1x8xf32>
    %166 = vector.broadcast %165 : vector<1x8xf32> to vector<8x8xf32>
    %167 = arith.addf %164, %166 : vector<8x8xf32>
    %168 = vector.extract_strided_slice %161 {offsets = [0, 8], sizes = [8, 8], strides = [1, 1]} : vector<8x16xf32> to vector<8x8xf32>
    %169 = vector.extract_strided_slice %163 {offsets = [1, 8], sizes = [1, 8], strides = [1, 1]} : vector<2x16xf32> to vector<1x8xf32>
    %170 = vector.broadcast %169 : vector<1x8xf32> to vector<8x8xf32>
    %171 = arith.addf %168, %170 : vector<8x8xf32>
    %172 = vector.extract_strided_slice %171 {offsets = [0, 1], sizes = [8, 7], strides = [1, 1]} : vector<8x8xf32> to vector<8x7xf32>
    %173 = vector.extract_strided_slice %171 {offsets = [0, 0], sizes = [8, 1], strides = [1, 1]} : vector<8x8xf32> to vector<8x1xf32>
    %174 = tpu.concatenate %172, %173 in 1 : vector<8x7xf32>, vector<8x1xf32> -> vector<8x8xf32>
    %c0_i32_50 = arith.constant 0 : i32
    %175 = vector.broadcast %c0_i32_50 : i32 to vector<8x8xi32>
    %176 = arith.shrsi %23, %175 : vector<8x8xi32>
    %c1_i32_51 = arith.constant 1 : i32
    %177 = vector.broadcast %c1_i32_51 : i32 to vector<8x8xi32>
    %178 = arith.andi %176, %177 : vector<8x8xi32>
    %c1_i32_52 = arith.constant 1 : i32
    %179 = vector.broadcast %c1_i32_52 : i32 to vector<8x8xi32>
    %180 = arith.cmpi eq, %178, %179 : vector<8x8xi32>
    %181 = arith.select %180, %174, %171 : vector<8x8xi1>, vector<8x8xf32>
    %182 = vector.extract_strided_slice %181 {offsets = [0, 2], sizes = [8, 6], strides = [1, 1]} : vector<8x8xf32> to vector<8x6xf32>
    %183 = vector.extract_strided_slice %181 {offsets = [0, 0], sizes = [8, 2], strides = [1, 1]} : vector<8x8xf32> to vector<8x2xf32>
    %184 = tpu.concatenate %182, %183 in 1 : vector<8x6xf32>, vector<8x2xf32> -> vector<8x8xf32>
    %c1_i32_53 = arith.constant 1 : i32
    %185 = vector.broadcast %c1_i32_53 : i32 to vector<8x8xi32>
    %186 = arith.shrsi %23, %185 : vector<8x8xi32>
    %c1_i32_54 = arith.constant 1 : i32
    %187 = vector.broadcast %c1_i32_54 : i32 to vector<8x8xi32>
    %188 = arith.andi %186, %187 : vector<8x8xi32>
    %c1_i32_55 = arith.constant 1 : i32
    %189 = vector.broadcast %c1_i32_55 : i32 to vector<8x8xi32>
    %190 = arith.cmpi eq, %188, %189 : vector<8x8xi32>
    %191 = arith.select %190, %184, %181 : vector<8x8xi1>, vector<8x8xf32>
    %192 = vector.extract_strided_slice %191 {offsets = [0, 4], sizes = [8, 4], strides = [1, 1]} : vector<8x8xf32> to vector<8x4xf32>
    %193 = vector.extract_strided_slice %191 {offsets = [0, 0], sizes = [8, 4], strides = [1, 1]} : vector<8x8xf32> to vector<8x4xf32>
    %194 = tpu.concatenate %192, %193 in 1 : vector<8x4xf32>, vector<8x4xf32> -> vector<8x8xf32>
    %c2_i32_56 = arith.constant 2 : i32
    %195 = vector.broadcast %c2_i32_56 : i32 to vector<8x8xi32>
    %196 = arith.shrsi %23, %195 : vector<8x8xi32>
    %c1_i32_57 = arith.constant 1 : i32
    %197 = vector.broadcast %c1_i32_57 : i32 to vector<8x8xi32>
    %198 = arith.andi %196, %197 : vector<8x8xi32>
    %c1_i32_58 = arith.constant 1 : i32
    %199 = vector.broadcast %c1_i32_58 : i32 to vector<8x8xi32>
    %200 = arith.cmpi eq, %198, %199 : vector<8x8xi32>
    %201 = arith.select %200, %194, %191 : vector<8x8xi1>, vector<8x8xf32>
    %202 = vector.extract_strided_slice %201 {offsets = [1, 0], sizes = [7, 8], strides = [1, 1]} : vector<8x8xf32> to vector<7x8xf32>
    %203 = vector.extract_strided_slice %201 {offsets = [0, 0], sizes = [1, 8], strides = [1, 1]} : vector<8x8xf32> to vector<1x8xf32>
    %204 = tpu.concatenate %202, %203 in 0 : vector<7x8xf32>, vector<1x8xf32> -> vector<8x8xf32>
    %cst_59 = arith.constant 0.000000e+00 : f32
    %205 = vector.broadcast %cst_59 : f32 to vector<8x8xf32>
    %206 = arith.select %21, %205, %204 : vector<8x8xi1>, vector<8x8xf32>
    %207 = arith.select %19, %201, %206 : vector<8x8xi1>, vector<8x8xf32>
    %208 = arith.addf %167, %207 : vector<8x8xf32>
    %cst_60 = arith.constant dense<0xFF800000> : vector<8xf32>
    %209 = vector.multi_reduction <maximumf>, %208, %cst_60 [1] : vector<8x8xf32> to vector<8xf32>
    %210 = vector.shape_cast %209 : vector<8xf32> to vector<8x1xf32>
    %211 = vector.broadcast %210 : vector<8x1xf32> to vector<8x8xf32>
    %212 = arith.subf %208, %211 : vector<8x8xf32>
    %213 = math.exp %212 : vector<8x8xf32>
    %cst_61 = arith.constant dense<0.000000e+00> : vector<8xf32>
    %214 = vector.multi_reduction <add>, %213, %cst_61 [1] : vector<8x8xf32> to vector<8xf32>
    %215 = vector.shape_cast %214 : vector<8xf32> to vector<8x1xf32>
    %216 = tpu.reciprocal %215 {approx = true} : vector<8x1xf32> -> vector<8x1xf32>
    %217 = vector.broadcast %216 : vector<8x1xf32> to vector<8x8xf32>
    %218 = arith.mulf %213, %217 : vector<8x8xf32>
    %219 = arith.truncf %218 : vector<8x8xf32> to vector<8x8xbf16>
    %cst_62 = arith.constant dense<0.000000e+00> : vector<8x32xf32>
    %220 = tpu.matmul %219, %160, %cst_62 {dimension_numbers = #tpu.dot_dimension_numbers<[1], [0], [0], [1], [0, 0, 1, 1], [], []>} : vector<8x8xbf16>, vector<8x32xbf16>, vector<8x32xf32> -> vector<8x32xf32>
    %221 = arith.truncf %220 : vector<8x32xf32> to vector<8x32xbf16>
    %c0_63 = arith.constant 0 : index
    %c0_64 = arith.constant 0 : index
    %c64 = arith.constant 64 : index
    %222 = vector.load %arg8[%c0_63, %c0_64, %c64] : memref<1x8x128xbf16, #tpu.memory_space<vmem>>, vector<1x8x32xbf16>
    %223 = vector.shape_cast %222 : vector<1x8x32xbf16> to vector<8x32xbf16>
    %224 = vector.shape_cast %221 : vector<8x32xbf16> to vector<1x8x32xbf16>
    tpu.vector_store %arg8[%c0_63, %c0_64, %c64], %224 {strides = array<i32>} : memref<1x8x128xbf16, #tpu.memory_space<vmem>>, vector<1x8x32xbf16>,
    %225 = vector.extract_strided_slice %5 {offsets = [0, 96], sizes = [8, 32], strides = [1, 1]} : vector<8x128xbf16> to vector<8x32xbf16>
    %226 = vector.extract_strided_slice %13 {offsets = [0, 96], sizes = [16, 32], strides = [1, 1]} : vector<16x128xbf16> to vector<16x32xbf16>
    %227 = vector.extract_strided_slice %11 {offsets = [0, 96], sizes = [8, 32], strides = [1, 1]} : vector<8x128xbf16> to vector<8x32xbf16>
    %cst_65 = arith.constant dense<0.000000e+00> : vector<8x16xf32>
    %228 = tpu.matmul %225, %226, %cst_65 {dimension_numbers = #tpu.dot_dimension_numbers<[1], [1], [0], [0], [0, 0, 1, 0], [], []>} : vector<8x32xbf16>, vector<16x32xbf16>, vector<8x16xf32> -> vector<8x16xf32>
    %229 = vector.extract_strided_slice %14 {offsets = [0, 96], sizes = [2, 32], strides = [1, 1]} : vector<2x128xbf16> to vector<2x32xbf16>
    %cst_66 = arith.constant dense<0.000000e+00> : vector<2x16xf32>
    %230 = tpu.matmul %229, %226, %cst_66 {dimension_numbers = #tpu.dot_dimension_numbers<[1], [1], [0], [0], [0, 0, 1, 0], [], []>} : vector<2x32xbf16>, vector<16x32xbf16>, vector<2x16xf32> -> vector<2x16xf32>
    %231 = vector.extract_strided_slice %228 {offsets = [0, 0], sizes = [8, 8], strides = [1, 1]} : vector<8x16xf32> to vector<8x8xf32>
    %232 = vector.extract_strided_slice %230 {offsets = [0, 0], sizes = [1, 8], strides = [1, 1]} : vector<2x16xf32> to vector<1x8xf32>
    %233 = vector.broadcast %232 : vector<1x8xf32> to vector<8x8xf32>
    %234 = arith.addf %231, %233 : vector<8x8xf32>
    %235 = vector.extract_strided_slice %228 {offsets = [0, 8], sizes = [8, 8], strides = [1, 1]} : vector<8x16xf32> to vector<8x8xf32>
    %236 = vector.extract_strided_slice %230 {offsets = [1, 8], sizes = [1, 8], strides = [1, 1]} : vector<2x16xf32> to vector<1x8xf32>
    %237 = vector.broadcast %236 : vector<1x8xf32> to vector<8x8xf32>
    %238 = arith.addf %235, %237 : vector<8x8xf32>
    %239 = vector.extract_strided_slice %238 {offsets = [0, 1], sizes = [8, 7], strides = [1, 1]} : vector<8x8xf32> to vector<8x7xf32>
    %240 = vector.extract_strided_slice %238 {offsets = [0, 0], sizes = [8, 1], strides = [1, 1]} : vector<8x8xf32> to vector<8x1xf32>
    %241 = tpu.concatenate %239, %240 in 1 : vector<8x7xf32>, vector<8x1xf32> -> vector<8x8xf32>
    %c0_i32_67 = arith.constant 0 : i32
    %242 = vector.broadcast %c0_i32_67 : i32 to vector<8x8xi32>
    %243 = arith.shrsi %23, %242 : vector<8x8xi32>
    %c1_i32_68 = arith.constant 1 : i32
    %244 = vector.broadcast %c1_i32_68 : i32 to vector<8x8xi32>
    %245 = arith.andi %243, %244 : vector<8x8xi32>
    %c1_i32_69 = arith.constant 1 : i32
    %246 = vector.broadcast %c1_i32_69 : i32 to vector<8x8xi32>
    %247 = arith.cmpi eq, %245, %246 : vector<8x8xi32>
    %248 = arith.select %247, %241, %238 : vector<8x8xi1>, vector<8x8xf32>
    %249 = vector.extract_strided_slice %248 {offsets = [0, 2], sizes = [8, 6], strides = [1, 1]} : vector<8x8xf32> to vector<8x6xf32>
    %250 = vector.extract_strided_slice %248 {offsets = [0, 0], sizes = [8, 2], strides = [1, 1]} : vector<8x8xf32> to vector<8x2xf32>
    %251 = tpu.concatenate %249, %250 in 1 : vector<8x6xf32>, vector<8x2xf32> -> vector<8x8xf32>
    %c1_i32_70 = arith.constant 1 : i32
    %252 = vector.broadcast %c1_i32_70 : i32 to vector<8x8xi32>
    %253 = arith.shrsi %23, %252 : vector<8x8xi32>
    %c1_i32_71 = arith.constant 1 : i32
    %254 = vector.broadcast %c1_i32_71 : i32 to vector<8x8xi32>
    %255 = arith.andi %253, %254 : vector<8x8xi32>
    %c1_i32_72 = arith.constant 1 : i32
    %256 = vector.broadcast %c1_i32_72 : i32 to vector<8x8xi32>
    %257 = arith.cmpi eq, %255, %256 : vector<8x8xi32>
    %258 = arith.select %257, %251, %248 : vector<8x8xi1>, vector<8x8xf32>
    %259 = vector.extract_strided_slice %258 {offsets = [0, 4], sizes = [8, 4], strides = [1, 1]} : vector<8x8xf32> to vector<8x4xf32>
    %260 = vector.extract_strided_slice %258 {offsets = [0, 0], sizes = [8, 4], strides = [1, 1]} : vector<8x8xf32> to vector<8x4xf32>
    %261 = tpu.concatenate %259, %260 in 1 : vector<8x4xf32>, vector<8x4xf32> -> vector<8x8xf32>
    %c2_i32_73 = arith.constant 2 : i32
    %262 = vector.broadcast %c2_i32_73 : i32 to vector<8x8xi32>
    %263 = arith.shrsi %23, %262 : vector<8x8xi32>
    %c1_i32_74 = arith.constant 1 : i32
    %264 = vector.broadcast %c1_i32_74 : i32 to vector<8x8xi32>
    %265 = arith.andi %263, %264 : vector<8x8xi32>
    %c1_i32_75 = arith.constant 1 : i32
    %266 = vector.broadcast %c1_i32_75 : i32 to vector<8x8xi32>
    %267 = arith.cmpi eq, %265, %266 : vector<8x8xi32>
    %268 = arith.select %267, %261, %258 : vector<8x8xi1>, vector<8x8xf32>
    %269 = vector.extract_strided_slice %268 {offsets = [1, 0], sizes = [7, 8], strides = [1, 1]} : vector<8x8xf32> to vector<7x8xf32>
    %270 = vector.extract_strided_slice %268 {offsets = [0, 0], sizes = [1, 8], strides = [1, 1]} : vector<8x8xf32> to vector<1x8xf32>
    %271 = tpu.concatenate %269, %270 in 0 : vector<7x8xf32>, vector<1x8xf32> -> vector<8x8xf32>
    %cst_76 = arith.constant 0.000000e+00 : f32
    %272 = vector.broadcast %cst_76 : f32 to vector<8x8xf32>
    %273 = arith.select %21, %272, %271 : vector<8x8xi1>, vector<8x8xf32>
    %274 = arith.select %19, %268, %273 : vector<8x8xi1>, vector<8x8xf32>
    %275 = arith.addf %234, %274 : vector<8x8xf32>
    %cst_77 = arith.constant dense<0xFF800000> : vector<8xf32>
    %276 = vector.multi_reduction <maximumf>, %275, %cst_77 [1] : vector<8x8xf32> to vector<8xf32>
    %277 = vector.shape_cast %276 : vector<8xf32> to vector<8x1xf32>
    %278 = vector.broadcast %277 : vector<8x1xf32> to vector<8x8xf32>
    %279 = arith.subf %275, %278 : vector<8x8xf32>
    %280 = math.exp %279 : vector<8x8xf32>
    %cst_78 = arith.constant dense<0.000000e+00> : vector<8xf32>
    %281 = vector.multi_reduction <add>, %280, %cst_78 [1] : vector<8x8xf32> to vector<8xf32>
    %282 = vector.shape_cast %281 : vector<8xf32> to vector<8x1xf32>
    %283 = tpu.reciprocal %282 {approx = true} : vector<8x1xf32> -> vector<8x1xf32>
    %284 = vector.broadcast %283 : vector<8x1xf32> to vector<8x8xf32>
    %285 = arith.mulf %280, %284 : vector<8x8xf32>
    %286 = arith.truncf %285 : vector<8x8xf32> to vector<8x8xbf16>
    %cst_79 = arith.constant dense<0.000000e+00> : vector<8x32xf32>
    %287 = tpu.matmul %286, %227, %cst_79 {dimension_numbers = #tpu.dot_dimension_numbers<[1], [0], [0], [1], [0, 0, 1, 1], [], []>} : vector<8x8xbf16>, vector<8x32xbf16>, vector<8x32xf32> -> vector<8x32xf32>
    %288 = arith.truncf %287 : vector<8x32xf32> to vector<8x32xbf16>
    %c0_80 = arith.constant 0 : index
    %c0_81 = arith.constant 0 : index
    %c96 = arith.constant 96 : index
    %289 = vector.load %arg8[%c0_80, %c0_81, %c96] : memref<1x8x128xbf16, #tpu.memory_space<vmem>>, vector<1x8x32xbf16>
    %290 = vector.shape_cast %289 : vector<1x8x32xbf16> to vector<8x32xbf16>
    %291 = vector.shape_cast %288 : vector<8x32xbf16> to vector<1x8x32xbf16>
    tpu.vector_store %arg8[%c0_80, %c0_81, %c96], %291 {strides = array<i32>} : memref<1x8x128xbf16, #tpu.memory_space<vmem>>, vector<1x8x32xbf16>,
    return
  }
  func.func @transform_0(%arg0: i32, %arg1: i32) -> (i32, i32, i32) {
    %c0_i32 = arith.constant 0 : i32
    %c0_i32_0 = arith.constant 0 : i32
    %c0_i32_1 = arith.constant 0 : i32
    return %arg0, %c0_i32, %c0_i32_0 : i32, i32, i32
  }
  func.func @transform_1(%arg0: i32, %arg1: i32) -> (i32, i32) {
    %c0_i32 = arith.constant 0 : i32
    %c0_i32_0 = arith.constant 0 : i32
    return %arg1, %c0_i32 : i32, i32
  }
  func.func @transform_2(%arg0: i32, %arg1: i32) -> (i32, i32) {
    %c0_i32 = arith.constant 0 : i32
    %c0_i32_0 = arith.constant 0 : i32
    return %arg1, %c0_i32 : i32, i32
  }
  func.func @transform_3(%arg0: i32, %arg1: i32) -> (i32, i32) {
    %c0_i32 = arith.constant 0 : i32
    %c0_i32_0 = arith.constant 0 : i32
    return %arg1, %c0_i32 : i32, i32
  }
  func.func @transform_4(%arg0: i32, %arg1: i32) -> (i32, i32) {
    %c0_i32 = arith.constant 0 : i32
    %c0_i32_0 = arith.constant 0 : i32
    return %c0_i32, %arg1 : i32, i32
  }
  func.func @transform_5(%arg0: i32, %arg1: i32) -> (i32, i32) {
    %c0_i32 = arith.constant 0 : i32
    %c0_i32_0 = arith.constant 0 : i32
    return %c0_i32, %arg1 : i32, i32
  }
  func.func @transform_6(%arg0: i32, %arg1: i32) -> (i32, i32, i32) {
    %c0_i32 = arith.constant 0 : i32
    %c0_i32_0 = arith.constant 0 : i32
    return %arg0, %c0_i32, %arg1 : i32, i32, i32
  }
}

</mosaic_0001>

<bundles_post_ra>
// kernel: decoder_layer_forward.3
= control target key start
LH: loop header
LB: loop body
LE: loop exit
PB: predicated region body
PF: predicated region fallthrough
CT: control target
= control target key end

     0   :  { %s1027_s2 = inlined_call_operand.vmem [shape: bf16[128,256], index: 2, kind: input, shape index: {}]   ;;  %s1028_s0 = inlined_call_operand.vmem [shape: bf16[16,256], index: 0, kind: input, shape index: {}]   ;;  %s1029_s5 = inlined_call_operand.vmem [shape: bf16[256,128], index: 5, kind: input, shape index: {}]   ;;  %s1030_s1 = inlined_call_operand.vmem [shape: f32[16,128], index: 1, kind: input, shape index: {}]   ;;  %s1031_s7 = inlined_call_operand.vmem [shape: bf16[128,256], index: 7, kind: input, shape index: {}]   ;;  %s1032_s3 = inlined_call_operand.vmem [shape: f32[1,128], index: 3, kind: input, shape index: {}]   ;;  %s1033_s4 = inlined_call_operand.vmem [shape: f32[1,128], index: 4, kind: input, shape index: {}]   ;;  %s1034_s6 = inlined_call_operand.vmem [shape: f32[1,256], index: 6, kind: input, shape index: {}]   ;;  %s1035_s8 = inlined_call_operand.vmem [shape: f32[1,128], index: 8, kind: input, shape index: {}]   ;;  %s1036_s9 = inlined_call_operand.vmem [shape: f32[1,128], index: 9, kind: input, shape index: {}]   ;;  %s1037_s10 = inlined_call_operand.vmem [shape: f32[1,128], index: 10, kind: input, shape index: {}]   ;;  %s1038_s11 = inlined_call_operand.vmem [shape: f32[16,128], index: 11, kind: output, shape index: {}]  }
   0x1   :  { %v700_v0 = vld [vmem:[%s1027_s2 + $0x4] ss:$8 sps:$4 sm:$0xff]   ;;  %v702_v1 = vld [vmem:[%s1027_s2] ss:$8 sps:$4 sm:$0xff]   ;;  %v703_v2 = vld [vmem:[%s1027_s2 + $0x14] ss:$8 sps:$4 sm:$0xff]  }
   0x2   :  { %147 = vmatprep.subr.bf16.mxu0 %v700_v0  ;;  %v705_v3 = vld [vmem:[%s1027_s2 + $0x10] ss:$8 sps:$4 sm:$0xff]   ;;  %v706_v4 = vld [vmem:[%s1027_s2 + $0x24] ss:$8 sps:$4 sm:$0xff]   ;;  %v708_v6 = vld [vmem:[%s1027_s2 + $0x20] ss:$8 sps:$4 sm:$0xff]  }
   0x3   :  { %148 = vmatpush1.bf16.xpose.msra.mxu0 %v702_v1  ;;  %v726_v5 = vld [vmem:[%s1028_s0 + $0x4] ss:$8 sps:$4 sm:$0xff]   ;;  %v709_v7 = vld [vmem:[%s1027_s2 + $0x34] ss:$8 sps:$4 sm:$0xff]   ;;  %v711_v8 = vld [vmem:[%s1027_s2 + $0x30] ss:$8 sps:$4 sm:$0xff]  }
   0x4   :  { %149 = vmatprep.subr.bf16.mxu0 %v703_v2  ;;  %179 = vmatprep.mubr.bf16.mxu0 %v726_v5  ;;  %v712_v9 = vld [vmem:[%s1027_s2 + $0x44] ss:$8 sps:$4 sm:$0xff]   ;;  %v714_v10 = vld [vmem:[%s1027_s2 + $0x40] ss:$8 sps:$4 sm:$0xff]   ;;  %v715_v11 = vld [vmem:[%s1027_s2 + $0x54] ss:$8 sps:$4 sm:$0xff]  }
   0x5   :  { %v717_v12 = vld [vmem:[%s1027_s2 + $0x50] ss:$8 sps:$4 sm:$0xff]   ;;  %v718_v13 = vld [vmem:[%s1027_s2 + $0x64] ss:$8 sps:$4 sm:$0xff]   ;;  %v720_v14 = vld [vmem:[%s1027_s2 + $0x60] ss:$8 sps:$4 sm:$0xff]  }
   0x6   :  { %v721_v15 = vld [vmem:[%s1027_s2 + $0x74] ss:$8 sps:$4 sm:$0xff]   ;;  %v723_v16 = vld [vmem:[%s1027_s2 + $0x70] ss:$8 sps:$4 sm:$0xff]   ;;  %v724_v17 = vld [vmem:[%s1028_s0] ss:$8 sps:$4 sm:$0xff]  }
   0x7   :  { %v727_v18 = vld [vmem:[%s1029_s5 + $0x40] sm:$0xff]   ;;  %v729_v20 = vld [vmem:[%s1029_s5 + $0x48] sm:$0xff]   ;;  %v731_v22 = vld [vmem:[%s1029_s5 + $0x50] sm:$0xff]  }
   0x8   :  { %v728_v19 = vld [vmem:[%s1029_s5] sm:$0xff]   ;;  %682 = vmatprep.subr.bf16.mxu1 %v727_v18  ;;  %v730_v21 = vld [vmem:[%s1029_s5 + $0x8] sm:$0xff]   ;;  %v732_v23 = vld [vmem:[%s1029_s5 + $0x10] sm:$0xff]  }
   0x9   :  { %683 = vmatpush3.bf16.xpose.msra.mxu1 %v728_v19  ;;  %v733_v24 = vld [vmem:[%s1029_s5 + $0x58] sm:$0xff]   ;;  %v188_v26 = vld [vmem:[%s1030_s1] sm:$0xff]  ;;  %v189_v28 = vld [vmem:[%s1030_s1 + $0x8] sm:$0xff] }
   0xa   :  { %684 = vmatprep.subr.bf16.mxu1 %v729_v20  ;;  %v734_v25 = vld [vmem:[%s1029_s5 + $0x18] sm:$0xff]   ;;  %v735_v36 = vld [vmem:[%s1029_s5 + $0x60] sm:$0xff]   ;;  %v737_v38 = vld [vmem:[%s1029_s5 + $0x68] sm:$0xff]  }
   0xb   :  { %150 = vmatpush1.bf16.xpose.msra.mxu0 %v705_v3  ;;  %v736_v37 = vld [vmem:[%s1029_s5 + $0x20] sm:$0xff]   ;;  %v738_v39 = vld [vmem:[%s1029_s5 + $0x28] sm:$0xff]   ;;  %v739_v40 = vld [vmem:[%s1029_s5 + $0x70] sm:$0xff]  }
   0xc   :  { %151 = vmatprep.subr.bf16.mxu0 %v706_v4  ;;  %v740_v41 = vld [vmem:[%s1029_s5 + $0x30] sm:$0xff]   ;;  %v741_v42 = vld [vmem:[%s1029_s5 + $0x78] sm:$0xff]   ;;  %v743_v44 = vld [vmem:[%s1031_s7] ss:$8 sps:$4 sm:$0xff]  }
   0xd   :  { %v742_v43 = vld [vmem:[%s1029_s5 + $0x38] sm:$0xff]   ;;  %v745_v45 = vld [vmem:[%s1031_s7 + $0x4] ss:$8 sps:$4 sm:$0xff]   ;;  %v749_v49 = vld [vmem:[%s1031_s7 + $0x20] ss:$8 sps:$4 sm:$0xff]  }
   0xe   :  { %v748_v46 = vld [vmem:[%s1031_s7 + $0x14] ss:$8 sps:$4 sm:$0xff]   ;;  %v746_v47 = vld [vmem:[%s1031_s7 + $0x10] ss:$8 sps:$4 sm:$0xff]   ;;  %v751_v48 = vld [vmem:[%s1031_s7 + $0x24] ss:$8 sps:$4 sm:$0xff]  }
   0xf   :  { %v754_v50 = vld [vmem:[%s1031_s7 + $0x34] ss:$8 sps:$4 sm:$0xff]   ;;  %v752_v51 = vld [vmem:[%s1031_s7 + $0x30] ss:$8 sps:$4 sm:$0xff]   ;;  %v757_v52 = vld [vmem:[%s1031_s7 + $0x44] ss:$8 sps:$4 sm:$0xff]  }
  0x10   :  { %v755_v53 = vld [vmem:[%s1031_s7 + $0x40] ss:$8 sps:$4 sm:$0xff]   ;;  %v760_v54 = vld [vmem:[%s1031_s7 + $0x54] ss:$8 sps:$4 sm:$0xff]   ;;  %v758_v55 = vld [vmem:[%s1031_s7 + $0x50] ss:$8 sps:$4 sm:$0xff]  }
  0x11   :  { %685 = vmatpush3.bf16.xpose.msra.mxu1 %v730_v21  ;;  %v763_v56 = vld [vmem:[%s1031_s7 + $0x64] ss:$8 sps:$4 sm:$0xff]   ;;  %v761_v57 = vld [vmem:[%s1031_s7 + $0x60] ss:$8 sps:$4 sm:$0xff]  }
  0x12   :  { %686 = vmatprep.subr.bf16.mxu1 %v731_v22  ;;  %v646_v18 = vld [vmem:[%s1033_s4] ss:$0 sm:$0xff] }
  0x13   :  { %152 = vmatpush1.bf16.xpose.msra.mxu0 %v708_v6 }
  0x14   :  { %153 = vmatprep.subr.bf16.mxu0 %v709_v7 }
  0x19   :  { %687 = vmatpush3.bf16.xpose.msra.mxu1 %v732_v23  ;;  %v766_v23 = vld [vmem:[%s1031_s7 + $0x74] ss:$8 sps:$4 sm:$0xff]  }
  0x1a   :  { %688 = vmatprep.subr.bf16.mxu1 %v733_v24  ;;  %v764_v24 = vld [vmem:[%s1031_s7 + $0x70] ss:$8 sps:$4 sm:$0xff]  }
  0x1b   :  { %154 = vmatpush1.bf16.xpose.msra.mxu0 %v711_v8 }
  0x1c   :  { %155 = vmatprep.subr.bf16.mxu0 %v712_v9 }
  0x21   :  { %689 = vmatpush3.bf16.xpose.msra.mxu1 %v734_v25  ;;  %v274_v25 = vlaneseq }
  0x22   :  { %690 = vmatprep.subr.bf16.mxu1 %v735_v36 }
  0x23   :  { %156 = vmatpush1.bf16.xpose.msra.mxu0 %v714_v10 }
  0x24   :  { %157 = vmatprep.subr.bf16.mxu0 %v715_v11 }
  0x29   :  { %691 = vmatpush3.bf16.xpose.msra.mxu1 %v736_v37 }
  0x2a   :  { %692 = vmatprep.subr.bf16.mxu1 %v737_v38 }
  0x2b   :  { %158 = vmatpush1.bf16.xpose.msra.mxu0 %v717_v12 }
  0x2c   :  { %159 = vmatprep.subr.bf16.mxu0 %v718_v13  ;;  %v645_v13 = vld [vmem:[%s1032_s3] ss:$0 sm:$0xff] }
  0x31   :  { %693 = vmatpush3.bf16.xpose.msra.mxu1 %v738_v39 }
  0x32   :  { %694 = vmatprep.subr.bf16.mxu1 %v739_v40 }
  0x33   :  { %160 = vmatpush1.bf16.xpose.msra.mxu0 %v720_v14 }
  0x34   :  { %161 = vmatprep.subr.bf16.mxu0 %v721_v15 }
  0x39   :  { %695 = vmatpush3.bf16.xpose.msra.mxu1 %v740_v41 }
  0x3a   :  { %696 = vmatprep.subr.bf16.mxu1 %v741_v42 }
  0x3b   :  { %162 = vmatpush1.bf16.xpose.msra.mxu0 %v723_v16 }
  0x3c   :  { %532 = vmatprep.subr.bf16.mxu0 %v745_v45 }
  0x41   :  { %697 = vmatpush3.bf16.xpose.msra.mxu1 %v742_v43 }
  0x42   :  { %180 = vmatmul.mubr.bf16.vlgmr.msra.gmra.mrb[0].mxu0 %v724_v17 }
  0x43   :  { %533 = vmatpush1.bf16.xpose.msra.mxu0 %v743_v44 }
  0x44   :  { %534 = vmatprep.subr.bf16.mxu0 %v748_v46  ;;  %v663_v46 = vld [vmem:[%s1035_s8] ss:$0 sm:$0xff] }
  0x4b   :  { %535 = vmatpush1.bf16.xpose.msra.mxu0 %v746_v47 }
  0x4c   :  { %536 = vmatprep.subr.bf16.mxu0 %v751_v48 }
  0x53   :  { %537 = vmatpush1.bf16.xpose.msra.mxu0 %v749_v49 }
  0x54   :  { %538 = vmatprep.subr.bf16.mxu0 %v754_v50 }
  0x5b   :  { %539 = vmatpush1.bf16.xpose.msra.mxu0 %v752_v51 }
  0x5c   :  { %540 = vmatprep.subr.bf16.mxu0 %v757_v52 }
  0x63   :  { %541 = vmatpush1.bf16.xpose.msra.mxu0 %v755_v53 }
  0x64   :  { %542 = vmatprep.subr.bf16.mxu0 %v760_v54 }
  0x6b   :  { %543 = vmatpush1.bf16.xpose.msra.mxu0 %v758_v55 }
  0x6c   :  { %544 = vmatprep.subr.bf16.mxu0 %v763_v56 }
  0x73   :  { %545 = vmatpush1.bf16.xpose.msra.mxu0 %v761_v57 }
  0x74   :  { %546 = vmatprep.subr.bf16.mxu0 %v766_v23 }
  0x7b   :  { %547 = vmatpush1.bf16.xpose.msra.mxu0 %v764_v24 }
 0x115   :  { %v181_v27 = vpop.f32.mrb[0].mxu0 }
 0x116   :  { %v919_v29 = vadd.f32 %v188_v26, %v181_v27  ;;  %v183_v30 = vpop.f32.mrb[1].mxu0  ;;  %v275_v26 = vshrl.u32 %v274_v25, 7 }
 0x117   :  { %v184_v31 = vpop.f32.mrb[2].mxu0 }
 0x118   :  { %v921_v32 = vadd.f32 %v189_v28, %v184_v31  ;;  %194 = vadd.xlane.f32.xlu0 %v919_v29  ;;  %v186_v33 = vpop.f32.mrb[3].mxu0  ;;  %v201_v34 = vmul.f32 %v919_v29, %v919_v29  ;;  %v276_v27 = vsub.s32 0, %v275_v26  ;;  %v272_v28 = vld [vmem:[%s1034_s6] sm:$0x3] }
 0x11a   :  { %203 = vadd.xlane.f32.xlu1 %v201_v34  ;;  %v202_v35 = vmul.f32 %v921_v32, %v921_v32  ;;  %v277_v30 = vrot.slane %v272_v28, %v276_v27 }
 0x11c   :  { %196 = vadd.xlane.f32.xlu0 %v921_v32 }
 0x11e   :  { %205 = vadd.xlane.f32.xlu1 %v202_v35 }
 0x1a5   :  { %v195_v58 = vpop.xlane.xlu0 %194 }
 0x1a6   :  { %v199_v59 = vmul.f32 0.0078125, %v195_v58 }
 0x1a7   :  { %v204_v60 = vpop.xlane.xlu1 %203 }
 0x1a8   :  { %v209_v61 = vmul.f32 %v199_v59, %v199_v59  ;;  %v207_v62 = vmul.f32 0.0078125, %v204_v60  ;;  %v215_v10 = vsub.f32 %v919_v29, %v199_v59  ;;  %v280_v29 = vsub.s32 1, %v275_v26 }
 0x1a9   :  { %v197_v63 = vpop.xlane.xlu0 %196 }
 0x1aa   :  { %v211_v0 = vsub.f32 %v207_v62, %v209_v61  ;;  %v200_v1 = vmul.f32 0.0078125, %v197_v63  ;;  %v281_v31 = vrot.slane %v272_v28, %v280_v29 }
 0x1ab   :  { %v206_v2 = vpop.xlane.xlu1 %205 }
 0x1ac   :  { %v213_v3 = vmax.f32 %v211_v0, 0.0  ;;  %v210_v4 = vmul.f32 %v200_v1, %v200_v1  ;;  %v208_v5 = vmul.f32 0.0078125, %v206_v2  ;;  %v216_v14 = vsub.f32 %v921_v32, %v200_v1 }
 0x1ae   :  { %v217_v6 = vadd.f32 1e-05, %v213_v3  ;;  %v212_v7 = vsub.f32 %v208_v5, %v210_v4 }
 0x1b0   :  { %767 = vrsqrt.f32 %v217_v6  ;;  %v214_v8 = vmax.f32 %v212_v7, 0.0 }
 0x1b2   :  { %v218_v9 = vadd.f32 1e-05, %v214_v8 }
 0x1b4   :  { %769 = vrsqrt.f32 %v218_v9 }
 0x1ba   :  { %v768_v11 = vpop.eup %767 }
 0x1bb   :  { %v221_v12 = vmul.f32 %v768_v11, %v215_v10  ;;  %v680_v11 = vld [vmem:[%s1036_s9] ss:$0 sm:$0xff] }
 0x1bd   :  { %v229_v17 = vmul.f32 %v645_v13, %v221_v12 }
 0x1be   :  { %v770_v15 = vpop.eup %769 }
 0x1bf   :  { %v222_v16 = vmul.f32 %v770_v15, %v216_v14  ;;  %v237_v20 = vadd.f32 %v646_v18, %v229_v17  ;;  %v681_v15 = vld [vmem:[%s1037_s10] ss:$0 sm:$0xff] }
 0x1c1   :  { %v230_v19 = vmul.f32 %v645_v13, %v222_v16 }
 0x1c3   :  { %v238_v21 = vadd.f32 %v646_v18, %v230_v19 }
 0x1c5   :  { %v239_v22 = vpack.c.bf16 %v238_v21, %v237_v20 }
 0x1c7   :  { %698 = vmatprep.mubr.bf16.mxu1 %v239_v22 }
 0x1c8   :  { %699 = vmatmul.mubr.bf16.vlgmr.msra.gmra.mrb[0].mxu1 %v239_v22 }
 0x29b   :  { %v414_v32 = vpop.f32.mrb[0].mxu1 }
 0x29c   :  { %v415_v33 = vadd.f32 %v414_v32, %v277_v30  ;;  %v416_v34 = vpop.f32.mrb[1].mxu1 }
 0x29d   :  { %v417_v35 = vadd.f32 %v416_v34, %v281_v31  ;;  %v418_v36 = vpop.f32.mrb[2].mxu1 }
 0x29e   :  { %v419_v37 = vadd.f32 %v418_v36, %v277_v30  ;;  %v420_v38 = vpop.f32.mrb[3].mxu1  ;;  %v423_v40 = vmax.f32 %v415_v33, 0.0 }
 0x29f   :  { %v421_v39 = vadd.f32 %v420_v38, %v281_v31  ;;  %v424_v42 = vmax.f32 %v417_v35, 0.0 }
 0x2a0   :  { %v425_v41 = vmax.f32 %v419_v37, 0.0 }
 0x2a1   :  { %v426_v43 = vmax.f32 %v421_v39, 0.0 }
 0x2a2   :  { %v427_v44 = vpack.c.bf16 %v425_v41, %v423_v40 }
 0x2a3   :  { %v428_v45 = vpack.c.bf16 %v426_v43, %v424_v42 }
 0x2a5   :  { %564 = vmatprep.mubr.bf16.mxu0 %v428_v45 }
 0x2a6   :  { %565 = vmatmul.mubr.bf16.vlgmr.msra.gmra.mrb[4].mxu0 %v427_v44 }
 0x379   :  { %v566_v47 = vpop.f32.mrb[4].mxu0 }
 0x37a   :  { %v567_v48 = vadd.f32 %v663_v46, %v566_v47  ;;  %v568_v49 = vpop.f32.mrb[5].mxu0 }
 0x37b   :  { %v569_v50 = vpop.f32.mrb[6].mxu0 }
 0x37c   :  { %v573_v51 = vadd.f32 %v567_v48, %v237_v20  ;;  %v570_v52 = vadd.f32 %v663_v46, %v569_v50  ;;  %v571_v53 = vpop.f32.mrb[7].mxu0 }
 0x37e   :  { %v574_v54 = vadd.f32 %v570_v52, %v238_v21  ;;  %577 = vadd.xlane.f32.xlu0 %v573_v51  ;;  %v583_v55 = vmul.f32 %v573_v51, %v573_v51 }
 0x380   :  { %579 = vadd.xlane.f32.xlu1 %v574_v54  ;;  %v584_v56 = vmul.f32 %v574_v54, %v574_v54 }
 0x382   :  { %585 = vadd.xlane.f32.xlu0 %v583_v55 }
 0x384   :  { %587 = vadd.xlane.f32.xlu1 %v584_v56 }
 0x40b   :  { %v578_v57 = vpop.xlane.xlu0 %577 }
 0x40c   :  { %v581_v58 = vmul.f32 0.0078125, %v578_v57 }
 0x40d   :  { %v580_v59 = vpop.xlane.xlu1 %579 }
 0x40e   :  { %v582_v60 = vmul.f32 0.0078125, %v580_v59  ;;  %v591_v62 = vmul.f32 %v581_v58, %v581_v58  ;;  %v597_v9 = vsub.f32 %v573_v51, %v581_v58 }
 0x40f   :  { %v586_v61 = vpop.xlane.xlu0 %585 }
 0x410   :  { %v589_v63 = vmul.f32 0.0078125, %v586_v61  ;;  %v592_v1 = vmul.f32 %v582_v60, %v582_v60  ;;  %v598_v12 = vsub.f32 %v574_v54, %v582_v60 }
 0x411   :  { %v588_v0 = vpop.xlane.xlu1 %587 }
 0x412   :  { %v593_v2 = vsub.f32 %v589_v63, %v591_v62  ;;  %v590_v3 = vmul.f32 0.0078125, %v588_v0 }
 0x414   :  { %v595_v4 = vmax.f32 %v593_v2, 0.0  ;;  %v594_v5 = vsub.f32 %v590_v3, %v592_v1 }
 0x416   :  { %v599_v6 = vadd.f32 1e-05, %v595_v4  ;;  %v596_v7 = vmax.f32 %v594_v5, 0.0 }
 0x418   :  { %771 = vrsqrt.f32 %v599_v6  ;;  %v600_v8 = vadd.f32 1e-05, %v596_v7 }
 0x41a   :  { %773 = vrsqrt.f32 %v600_v8 }
 0x422   :  { %v772_v10 = vpop.eup %771 }
 0x423   :  { %v603_v13 = vmul.f32 %v772_v10, %v597_v9 }
 0x424   :  { %v774_v14 = vpop.eup %773 }
 0x425   :  { %v611_v16 = vmul.f32 %v680_v11, %v603_v13  ;;  %v604_v17 = vmul.f32 %v774_v14, %v598_v12 }
 0x427   :  { %v619_v18 = vadd.f32 %v681_v15, %v611_v16  ;;  %v612_v19 = vmul.f32 %v680_v11, %v604_v17 }
 0x429   :  { %621 = vst [vmem:[%s1038_s11] sm:$0xff] %v619_v18  ;;  %v620_v20 = vadd.f32 %v681_v15, %v612_v19 }
 0x42b   :  { %622 = vst [vmem:[%s1038_s11 + $0x8] sm:$0xff] %v620_v20 }

// kernel: decoder_layer_forward.2
= control target key start
LH: loop header
LB: loop body
LE: loop exit
PB: predicated region body
PF: predicated region fallthrough
CT: control target
= control target key end

     0   :  { %11 = vsyncpa [#allocation3], 0  ;;  %s2726_s0 = inlined_call_operand.vmem [shape: f32[2,8,128], index: 0, kind: input, shape index: {}]   ;;  %s2727_s1 = inlined_call_operand.vmem [shape: bf16[256,128], index: 1, kind: input, shape index: {}]   ;;  %s2728_s2 = inlined_call_operand.hbm [shape: bf16[256,128], index: 2, kind: input, shape index: {}]   ;;  %s2729_s3 = inlined_call_operand.vmem [shape: bf16[256,128], index: 3, kind: input, shape index: {}]   ;;  %s2730_s4 = inlined_call_operand.vmem [shape: bf16[8,256], index: 4, kind: input, shape index: {}]   ;;  %s2731_s5 = inlined_call_operand.vmem [shape: bf16[2,256], index: 5, kind: input, shape index: {}]   ;;  %s2732_s6 = inlined_call_operand.vmem [shape: bf16[2,8,256], index: 6, kind: output, shape index: {}]  }
   0x1   :  { %13 = vsyncpa [#allocation3 + $0x1], 0  ;;  %s2252_s21 = smov 0   ;;  %s2254_s22 = smov 0  }
   0x2   :  { %s2256_s23 = smov 0   ;;  %s2258_s24 = smov 0  }
   0x3   :  { %s2260_s25 = smov 0   ;;  %s2262_s26 = smov 0  }
   0x4   :  { %s2264_s27 = smov 0   ;;  %s2266_s28 = smov 0  }
   0x5 LB: > { %s1730_s29 = sadd.s32 4294967295, %s2199_s28   ;;  %s28_s30 = sadd.s32 1, %s2191_s26  ;;  %s2199_s28 = sphi %s2266_s28, %s19_s28   ;;  %s2195_s27 = sphi %s2264_s27, %s2744_s27   ;;  %s2191_s26 = sphi %s2262_s26, %s2743_s26   ;;  %s2187_s25 = sphi %s2260_s25, %s2742_s25   ;;  %s2183_s24 = sphi %s2258_s24, %s2741_s24   ;;  %s2179_s23 = sphi %s2256_s23, %s2740_s23   ;;  %s2175_s22 = sphi %s2254_s22, %s2739_s22   ;;  %s2171_s21 = sphi %s2252_s21, %s2738_s21  }
   0x6   : > { %p29_p0 = scmp.ge.s32.totalorder %s28_s30, 2  ;;  %s31_s7 = sadd.s32 1, %s2195_s27 }
   0x7   : > { %s90_s8 = sadd.s32 1, %s2179_s23  ;;  %p97_p1 = scmp.ne.s32.totalorder %s2179_s23, %s2175_s22 }
   0x8   : > { %s2746_s30 = smov (%p29_p0, %s28_s30), 0  ;;  %s2748_s7 = smov (!%p29_p0, %s31_s7), %s2195_s27 }
   0x9   : > { %s87_s9 = ssub.s32 %s2191_s26, %s2746_s30  ;;  %p98_p2 = scmp.eq.s32.totalorder %s2199_s28, 0 }
   0xa   : > { %p33_p3 = scmp.ge.s32.totalorder %s2748_s7, 2  ;;  %p88_p4 = scmp.eq.s32.totalorder %s87_s9, 0 }
   0xb   : > { %p2302_p5 = por %p98_p2, %p97_p1  ;;  %p103_p6 = scmp.ne.s32.totalorder %s2175_s22, %s2171_s21 }
   0xc   : > { %s2750_s7 = smov (%p33_p3, %s2748_s7), 0  ;;  %p104_p7 = scmp.eq.s32.totalorder %s1730_s29, 0 }
   0xd   : > { %s2310_s11 = scalar_select %p88_p4, %s2179_s23, %s90_s8  }
   0xe   : > { %p1982_p8 = scmp.lt.s32.totalorder %s2199_s28, 4  ;;  %s249_s12 = sand.u32 1, %s2179_s23  }
   0xf   : > { %p2314_p9 = por %p104_p7, %p103_p6  ;;  %s1734_s14 = sshll.u32 %s249_s12, 6 }
  0x10   : > { %s1789_s15 = sshll.u32 %s2191_s26, 10  ;;  %s253_s19 = scalar_lea.vmem [#allocation2], %s1734_s14 }
  0x11   : > { %s2322_s18 = scalar_lea.hbm %s2728_s2, %s1789_s15  ;;  %s260_s20 = sshll.u32 %s253_s19, 4  ;;  %s2330_s20 = int_to_ptr.vmem [resolvable:$true] %s260_s20 }
  0x12   : > { %p2326_p10 = pnand %p1982_p8, %p2302_p5  ;;  %s2332_s29 = scalar_lea.sflag [#allocation3], %s249_s12 }
  0x13   : > { %s2103_s8 = scalar_lea.hbm %s2322_s18, 1024  ;;  %s2108_s14 = scalar_lea.hbm %s2728_s2, 2048 }
  0x14   : > { %p2104_p11 = scmp.ne.s32.totalorder %s2322_s18, %s2103_s8  ;;  %p2105_p12 = pneg %p2326_p10 }
  0x15   : > { %p2109_p1 = scmp.lt.u32.totalorder %s2322_s18, %s2728_s2  ;;  %p2110_p2 = scmp.lt.u32.totalorder %s2108_s14, %s2103_s8 }
  0x16   : > { %p2106_p13 = pnand %p2105_p12, %p2104_p11  ;;  %p2112_p4 = scmp.lt.u32.totalorder %s2103_s8, %s2322_s18 }
  0x17   : > { %p2111_p3 = por %p2110_p2, %p2109_p1 }
  0x18   : > { %p2107_p0 = pneg %p2106_p13 }
  0x19   : > { %p2113_p5 = por %p2112_p4, %p2111_p3 }
  0x1b   : > { %p2114_p6 = pnand %p2113_p5, %p2107_p0 }
  0x1d   : > { %2117 = shalt.err (!%p2114_p6)
}
  0x1e   : > { %s2118_s12 = scalar_lea.vmem %s2330_s20, 1024  ;;  %s2201_s17 = smov [#allocation2]  }
  0x1f   : > { %p2119_p7 = scmp.ne.s32.totalorder %s2330_s20, %s2118_s12  ;;  %s2123_s19 = sshll.u32 %s2201_s17, 4  ;;  %s2124_s19 = int_to_ptr.vmem [resolvable:$false] %s2123_s19 }
  0x20   : > { %s2125_s9 = scalar_lea.vmem %s2124_s19, 2048  ;;  %p2126_p13 = scmp.lt.s32.totalorder %s2330_s20, %s2124_s19 }
  0x21   : > { %p2121_p8 = pnand %p2119_p7, %p2105_p12  ;;  %p2127_p1 = scmp.lt.s32.totalorder %s2125_s9, %s2118_s12 }
  0x23   : > { %p2122_p11 = pneg %p2121_p8  ;;  %p2128_p2 = por %p2127_p1, %p2126_p13 }
  0x25   : > { %p2129_p3 = pnand %p2128_p2, %p2122_p11 }
  0x27   : > { %2132 = shalt.err (!%p2129_p3)
}
  0x28   : > { %s2202_s8 = smov 64   ;;  %s2203_s10 = smov 4  }
  0x29   : > { %1981 = dma.hbm_to_vmem [thread:$0]  (!%p2326_p10), %s2322_s18, 1024, %s2330_s20, %s2332_s29, %s2202_s8, %s2202_s8, %s2203_s10  }
  0x2a   : > { %p1737_p12 = scmp.ge.s32.totalorder %s2199_s28, 1  ;;  %p290_p0 = scmp.lt.s32.totalorder %s2199_s28, 5 }
  0x2c   : > { %p291_p4 = pnand %p1737_p12, %p290_p0 }
  0x2d   : > { %s296_s14 = sand.u32 (!%p291_p4), 1, %s2175_s22  }
  0x2e   : > { %294 = sbr.rel (%p291_p4) target bundleno = 4290 (0x10c2), region = 44  ;;  %s1738_s15 = sshll.u32 (!%p291_p4), %s296_s14, 6 }
  0x2f   : > { %s297_s16 = scalar_lea.sflag (!%p291_p4), [#allocation3], %s296_s14  ;;  %s2363_s12 = scalar_lea.vmem (!%p291_p4), [#allocation2], %s1738_s15 }
  0x35   : > { %2166 = dma.done.wait (%p2314_p9), %s297_s16, 1024  }
  0x36   : > { %2168 = vsyncadd (%p2314_p9), %s297_s16, 4294966272  ;;  %s1740_s21 = sshll.u32 %s2183_s24, 4  ;;  %v2204_v0 = vmov 0.0   ;;  %vm2205_vm0 = vmmov 0   ;;  %v2062_v1 = vld [vmem:[%s2363_s12] sm:$0xff]   ;;  %p370_p9 = scmp.lt.s32.totalorder %s2183_s24, 1  ;;  %v712_v33 = vlaneseq }
  0x37   : > { %1864 = vmatprep.subr.bf16.mxu1 %v2204_v0  ;;  %1844 = vmatprep.subr.bf16.mxu0 %v2204_v0  ;;  %p358_p10 = scmp.lt.s32.totalorder %s1740_s21, 31  ;;  %v2064_v3 = vld [vmem:[%s2363_s12 + $0x8] sm:$0xff]   ;;  %v2066_v5 = vld [vmem:[%s2363_s12 + $0x10] sm:$0xff]   ;;  %v2068_v7 = vld [vmem:[%s2363_s12 + $0x18] sm:$0xff]   ;;  %p353_p5 = scmp.lt.s32.totalorder %s2187_s25, 1  ;;  %vm707_vm1 = vcmask 1043456  }
  0x38   : > { %1880 = vmatprep.mubr.msk.bf16.mxu1 %vm2205_vm0, %v2204_v0  ;;  %1860 = vmatprep.mubr.msk.bf16.mxu0 %vm2205_vm0, %v2204_v0  ;;  %s2754_s24 = smov (!%p370_p9, %s2183_s24), 1  ;;  %v2070_v9 = vld [vmem:[%s2363_s12 + $0x20] sm:$0xff]   ;;  %v2072_v11 = vld [vmem:[%s2363_s12 + $0x28] sm:$0xff]   ;;  %v2074_v13 = vld [vmem:[%s2363_s12 + $0x30] sm:$0xff]   ;;  %vm720_vm2 = vcmask 261120   ;;  %v2469_v36 = vshrl.u32 %v712_v33, 7 }
  0x39   : > { %s2752_s21 = smov (!%p358_p10, %s1740_s21), 31  ;;  %1865 = vmatpush3.bf16.xpose.msra.mxu1 %v2062_v1  ;;  %s1744_s17 = sshll.u32 %s2754_s24, 2  ;;  %v2076_v15 = vld [vmem:[%s2363_s12 + $0x38] sm:$0xff]   ;;  %vm826_vm3 = vcmask 56320   ;;  %vm841_vm5 = vcmask 48128   ;;  %vm854_vm7 = vcmask 31744  }
  0x3a   : > { %s1741_s13 = sshll.u32 %s2752_s21, 2  ;;  %1866 = vmatprep.subr.bf16.mxu1 %v2204_v0  ;;  %s2404_s15 = scalar_lea.vmem %s2730_s4, %s1744_s17  ;;  %v2472_v39 = vsub.s32 0, %v2469_v36  ;;  %v2475_v40 = vsub.s32 1, %v2469_v36  ;;  %v719_v49 = vsub.s32 7, %v2469_v36  ;;  %vm868_vm11 = vcmask 64512  }
  0x3b   : > { %s2379_s29 = scalar_lea.vmem %s2727_s1, %s1741_s13  ;;  %s2398_s8 = scalar_lea.vmem %s2729_s3, %s1741_s13  ;;  %v2078_v19 = vld [vmem:[%s2404_s15] ss:$0 sps:$4 sm:$0xff]   ;;  %vm928_vm12 = vcmask 257024   ;;  %vm1157_vm13 = vcmask 519424   ;;  %vm1368_vm14 = vcmask 781824   ;;  %vm1579_vm15 = vcmask 1044224  }
  0x3c   : > { %v2063_v2 = vld [vmem:[%s2379_s29] sm:$0xff]   ;;  %v2065_v4 = vld [vmem:[%s2379_s29 + $0x8] sm:$0xff]   ;;  %v2067_v6 = vld [vmem:[%s2379_s29 + $0x10] sm:$0xff]   ;;  %s2756_s25 = smov (!%p353_p5, %s2187_s25), 1  ;;  %s2206_s17 = smov 120   ;;  %v828_v50 = vand.u32 1, %v719_v49 }
  0x3d   : > { %1845 = vmatpush3.bf16.xpose.msra.mxu0 %v2063_v2  ;;  %v2069_v8 = vld [vmem:[%s2379_s29 + $0x18] sm:$0xff]   ;;  %v2071_v10 = vld [vmem:[%s2379_s29 + $0x20] sm:$0xff]   ;;  %v2073_v12 = vld [vmem:[%s2379_s29 + $0x28] sm:$0xff]   ;;  %s1739_s16 = sshll.u32 %s2756_s25, 3  ;;  %s2207_s19 = smov 119   ;;  %v843_v57 = vshra.s32 %v719_v49, 1 }
  0x3e   : > { %1846 = vmatprep.subr.bf16.mxu0 %v2204_v0  ;;  %v2075_v14 = vld [vmem:[%s2379_s29 + $0x30] sm:$0xff]   ;;  %v2077_v16 = vld [vmem:[%s2379_s29 + $0x38] sm:$0xff]   ;;  %s356_s18 = scalar_lea.vmem %s2726_s0, %s1739_s16  ;;  %s376_s29 = scalar_lea.vmem %s2731_s5, %s2754_s24  ;;  %vm2485_vm4 = vcmp.eq.s32.totalorder %v828_v50, 1  ;;  %v2079_v63 = vld [vmem:[%s2398_s8] sm:$0xff]  }
  0x3f   : > { %v386_v17 = vld [vmem:[%s356_s18] sm:$0xff]  ;;  %s2208_s9 = smov 127   ;;  %s2209_s10 = smov 6   ;;  %v2494_v58 = vand.u32 1, %v843_v57  ;;  %v2080_v1 = vld [vmem:[%s2398_s8 + $0x8] sm:$0xff]   ;;  %v2081_v2 = vld [vmem:[%s2398_s8 + $0x10] sm:$0xff]  }
  0x40   : > { %v2436_v18 = vpack.c.bf16 %v386_v17, %v386_v17  ;;  %v2462_v32 = vld [vmem:[%s376_s29] sm:$0x1]  ;;  %s2210_s14 = smov 126   ;;  %s2211_s15 = smov 4  }
  0x41   : > { %1867 = vmatpush3.bf16.xpose.msra.mxu1 %v2064_v3  ;;  %vm845_vm6 = vcmp.eq.s32.totalorder %v2494_v58, 1  ;;  %s2212_s16 = smov 124   ;;  %v2082_v3 = vld [vmem:[%s2398_s8 + $0x18] sm:$0xff]   ;;  %s1745_s21 = sshll.u32 %s2756_s25, 1 }
  0x42   : > { %1868 = vmatprep.subr.bf16.mxu1 %v2204_v0  ;;  %s382_s13 = sadd.s32 %s1745_s21, %s2754_s24  ;;  %s2215_s24 = smov 64  }
  0x43   : > { %s1746_s18 = sshll.u32 %s382_s13, 2  ;;  %s2216_s25 = smov 32  }
  0x44   : > { %s2572_s29 = scalar_lea.vmem %s2732_s6, %s1746_s18 }
  0x45   : > { %1847 = vmatpush3.bf16.xpose.msra.mxu0 %v2065_v4  ;;  %v2083_v4 = vld [vmem:[%s2398_s8 + $0x20] sm:$0xff]  }
  0x46   : > { %1848 = vmatprep.subr.bf16.mxu0 %v2204_v0 }
  0x49   : > { %1869 = vmatpush3.bf16.xpose.msra.mxu1 %v2066_v5  ;;  %v2084_v5 = vld [vmem:[%s2398_s8 + $0x28] sm:$0xff]  }
  0x4a   : > { %1870 = vmatprep.subr.bf16.mxu1 %v2204_v0 }
  0x4d   : > { %1849 = vmatpush3.bf16.xpose.msra.mxu0 %v2067_v6  ;;  %v2085_v6 = vld [vmem:[%s2398_s8 + $0x30] sm:$0xff]  }
  0x4e   : > { %1850 = vmatprep.subr.bf16.mxu0 %v2204_v0 }
  0x51   : > { %1871 = vmatpush3.bf16.xpose.msra.mxu1 %v2068_v7  ;;  %v2086_v7 = vld [vmem:[%s2398_s8 + $0x38] sm:$0xff]   ;;  %s2213_s8 = smov 96  }
  0x52   : > { %1872 = vmatprep.subr.bf16.mxu1 %v2204_v0 }
  0x55   : > { %1851 = vmatpush3.bf16.xpose.msra.mxu0 %v2069_v8  ;;  %v856_v8 = vshra.s32 %v719_v49, 2 }
  0x56   : > { %1852 = vmatprep.subr.bf16.mxu0 %v2204_v0 }
  0x59   : > { %1873 = vmatpush3.bf16.xpose.msra.mxu1 %v2070_v9  ;;  %v715_v9 = vand.u32 127, %v712_v33 }
  0x5a   : > { %1874 = vmatprep.subr.bf16.mxu1 %v2204_v0 }
  0x5d   : > { %1853 = vmatpush3.bf16.xpose.msra.mxu0 %v2071_v10  ;;  %v2522_v10 = vand.u32 1, %v856_v8 }
  0x5e   : > { %1854 = vmatprep.subr.bf16.mxu0 %v2204_v0 }
  0x5f   : > { %vm858_vm8 = vcmp.eq.s32.totalorder %v2522_v10, 1 }
  0x61   : > { %1875 = vmatpush3.bf16.xpose.msra.mxu1 %v2072_v11  ;;  %v2525_v11 = vsub.s32 %v715_v9, %v2469_v36 }
  0x62   : > { %1876 = vmatprep.subr.bf16.mxu1 %v2204_v0 }
  0x63   : > { %vm718_vm9 = vcmp.eq.s32.totalorder %v2525_v11, 1  ;;  %vm717_vm10 = vcmp.le.s32.totalorder %v2525_v11, 0 }
  0x65   : > { %1855 = vmatpush3.bf16.xpose.msra.mxu0 %v2073_v12 }
  0x66   : > { %1856 = vmatprep.subr.bf16.mxu0 %v2204_v0 }
  0x69   : > { %1877 = vmatpush3.bf16.xpose.msra.mxu1 %v2074_v13 }
  0x6a   : > { %1878 = vmatprep.subr.bf16.mxu1 %v2204_v0 }
  0x6d   : > { %1857 = vmatpush3.bf16.xpose.msra.mxu0 %v2075_v14 }
  0x6e   : > { %1858 = vmatprep.subr.bf16.mxu0 %v2204_v0 }
  0x71   : > { %1879 = vmatpush3.bf16.xpose.msra.mxu1 %v2076_v15 }
  0x72   : > { %1904 = vmatprep.subr.bf16.mxu1 %v2204_v0 }
  0x75   : > { %1859 = vmatpush3.bf16.xpose.msra.mxu0 %v2077_v16 }
  0x76   : > { %1884 = vmatprep.subr.bf16.mxu0 %v2204_v0 }
  0x78   : > { %1881 = vmatmul.mubr.bf16.vlgmr.msra.gmra.mrb[0].mxu1 %v2436_v18 }
  0x79   : > { %1906 = vmatprep.mubr.msk.bf16.mxu1 %vm2205_vm0, %v2204_v0 }
  0x7c   : > { %1861 = vmatmul.mubr.bf16.vlgmr.msra.gmra.mrb[0].mxu0 %v2436_v18 }
  0x7d   : > { %1900 = vmatprep.mubr.msk.bf16.mxu0 %vm2205_vm0, %v2204_v0  ;;  %1885 = vmatpush3.bf16.xpose.msra.mxu0 %v2079_v63 }
  0x7e   : > { %1886 = vmatprep.subr.bf16.mxu0 %v2204_v0 }
  0x85   : > { %1887 = vmatpush3.bf16.xpose.msra.mxu0 %v2080_v1 }
  0x86   : > { %1888 = vmatprep.subr.bf16.mxu0 %v2204_v0 }
  0x8d   : > { %1889 = vmatpush3.bf16.xpose.msra.mxu0 %v2081_v2 }
  0x8e   : > { %1890 = vmatprep.subr.bf16.mxu0 %v2204_v0 }
  0x95   : > { %1891 = vmatpush3.bf16.xpose.msra.mxu0 %v2082_v3 }
  0x96   : > { %1892 = vmatprep.subr.bf16.mxu0 %v2204_v0 }
  0x9d   : > { %1893 = vmatpush3.bf16.xpose.msra.mxu0 %v2083_v4 }
  0x9e   : > { %1894 = vmatprep.subr.bf16.mxu0 %v2204_v0 }
  0xa5   : > { %1895 = vmatpush3.bf16.xpose.msra.mxu0 %v2084_v5 }
  0xa6   : > { %1896 = vmatprep.subr.bf16.mxu0 %v2204_v0 }
  0xad   : > { %1897 = vmatpush3.bf16.xpose.msra.mxu0 %v2085_v6 }
  0xae   : > { %1898 = vmatprep.subr.bf16.mxu0 %v2204_v0 }
  0xb5   : > { %1899 = vmatpush3.bf16.xpose.msra.mxu0 %v2086_v7 }
  0xb6   : > { %1952 = vmatprep.subr.bf16.mxu0 %v2204_v0 }
  0xbc   : > { %1901 = vmatmul.mubr.bf16.vlgmr.msra.gmra.mrb[4].mxu0 %v2436_v18 }
  0xbd   : > { %1954 = vmatprep.mubr.msk.bf16.mxu0 %vm2205_vm0, %v2204_v0 }
 0x14b   : > { %v591_v20 = vpop.f32.mrb[0].mxu1 }
 0x14c   : > { %v597_v21 = vpack.c.bf16 %v591_v20, %v591_v20  ;;  %v1882_v22 = vpop.f32.mrb[1].mxu1 }
 0x14d   : > { %v594_v24 = vpop.f32.mrb[2].mxu1 }
 0x14e   : > { %v2446_v26 = vsel %vm707_vm1, %v597_v21, %v2078_v19  ;;  %v1883_v27 = vpop.f32.mrb[3].mxu1  ;;  %v2214_v21 = vmov 1966171168  }
 0x14f   : > { %v486_v23 = vpop.f32.mrb[0].mxu0  ;;  %v724_v29 = vsel %vm720_vm2, %v2446_v26, 0  ;;  %v984_v22 = vunpack.c.l.s4 %v2214_v21 }
 0x150   : > { %v1862_v25 = vpop.f32.mrb[1].mxu0  ;;  %1905 = vmatpush3.bf16.xpose.msra.mxu1 %v724_v29  ;;  %v2451_v31 = vpack.c.bf16 %v486_v23, %v486_v23 }
 0x151   : > { %v489_v28 = vpop.f32.mrb[2].mxu0  ;;  %1910 = vmatprep.subr.bf16.mxu1 %v2204_v0  ;;  %v985_v23 = vunpack.c.0.s8 %v984_v22 }
 0x152   : > { %v1863_v30 = vpop.f32.mrb[3].mxu0 }
 0x153   : > { %v988_v24 = vsub.s32 %v985_v23, %v2469_v36 }
 0x155   : > { %v989_v25 = vrot.slane %v2462_v32, %v988_v24 }
 0x157   : > { %1907 = vmatmul.mubr.msk.bf16.vlgmr.msra.gmra.mrb[4].mxu1 %vm720_vm2, %v2451_v31  ;;  %v2543_v27 = vrot.slane %v989_v25, %v988_v24 }
 0x158   : > { %1911 = vmatpush3.bf16.xpose.msra.mxu1 %v724_v29  ;;  %1912 = vmatprep.mubr.msk.bf16.mxu1 %vm2205_vm0, %v2204_v0 }
 0x159   : > { %1916 = vmatprep.subr.bf16.mxu1 %v2204_v0 }
 0x15f   : > { %1913 = vmatmul.mubr.msk.bf16.vlgmr.msra.gmra.mrb[8].mxu1 %vm720_vm2, %v2462_v32 }
 0x160   : > { %1918 = vmatprep.mubr.msk.bf16.mxu1 %vm2205_vm0, %v2204_v0 }
 0x22a   : > { %v760_v34 = vpop.f32.mrb[4].mxu1 }
 0x22b   : > { %v1908_v35 = vpop.f32.mrb[5].mxu1 }
 0x22c   : > { %v763_v37 = vpop.f32.mrb[6].mxu1  ;;  %v696_v35 = vpop.f32.mrb[4].mxu0 }
 0x22d   : > { %v1909_v38 = vpop.f32.mrb[7].mxu1  ;;  %v1902_v37 = vpop.f32.mrb[5].mxu0 }
 0x22e   : > { %v699_v38 = vpop.f32.mrb[6].mxu0 }
 0x22f   : > { %v1903_v36 = vpop.f32.mrb[7].mxu0 }
 0x232   : > { %v803_v41 = vpop.f32.mrb[8].mxu1 }
 0x233   : > { %v812_v42 = vrot.slane %v803_v41, %v2472_v39  ;;  %v817_v43 = vrot.slane %v803_v41, %v2475_v40  ;;  %v1914_v44 = vpop.f32.mrb[9].mxu1  ;;  %v2548_v41 = vpack.c.bf16 %v696_v35, %v696_v35 }
 0x234   : > { %v806_v45 = vpop.f32.mrb[10].mxu1 }
 0x235   : > { %v2479_v46 = vadd.f32 %v812_v42, %v760_v34  ;;  %v818_v47 = vadd.f32 %v817_v43, %v760_v34  ;;  %v1915_v48 = vpop.f32.mrb[11].mxu1  ;;  %v885_v32 = vsel %vm707_vm1, %v2548_v41, 0 }
 0x236   : > { %1917 = vmatpush3.bf16.msra.mxu1 %v885_v32 }
 0x237   : > { %830 = vrot.lane.b32.xlu1 %v818_v47, %s2206_s17  ;;  %820 = vrot.lane.b32.xlu0 %v818_v47, %s2207_s19 }
 0x238   : > { %1922 = vmatprep.subr.bf16.mxu1 %v2204_v0 }
 0x23b   : > { %823 = vrot.lane.b32.xlu0 %v818_v47, %s2208_s9 }
 0x2a9   : > { %v821_v51 = vpop.permute.xlu0 %820  ;;  %v831_v54 = vpop.permute.xlu1 %830 }
 0x2ad   : > { %v824_v53 = vpop.permute.xlu0 %823 }
 0x2ae   : > { %v827_v55 = vsel %vm826_vm3, %v821_v51, %v824_v53 }
 0x2af   : > { %v833_v56 = vsel %vm2485_vm4, %v827_v55, %v831_v54 }
 0x2b0   : > { %838 = vrot.lane.b32.xlu0 %v833_v56, %s2209_s10  ;;  %835 = vrot.lane.b32.xlu1 %v833_v56, %s2210_s14 }
 0x322   : > { %v839_v59 = vpop.permute.xlu0 %838  ;;  %v836_v60 = vpop.permute.xlu1 %835 }
 0x323   : > { %v842_v61 = vsel %vm841_vm5, %v836_v60, %v839_v59 }
 0x324   : > { %v846_v62 = vsel %vm845_vm6, %v842_v61, %v833_v56 }
 0x325   : > { %851 = vrot.lane.b32.xlu0 %v846_v62, %s2211_s15  ;;  %848 = vrot.lane.b32.xlu1 %v846_v62, %s2212_s16 }
 0x397   : > { %v852_v12 = vpop.permute.xlu0 %851  ;;  %v849_v13 = vpop.permute.xlu1 %848 }
 0x398   : > { %v855_v14 = vsel %vm854_vm7, %v849_v13, %v852_v12 }
 0x399   : > { %v859_v15 = vsel %vm858_vm8, %v855_v14, %v846_v62 }
 0x39a   : > { %v861_v16 = vrot.slane %v859_v15, 1 }
 0x39c   : > { %v865_v17 = vsel %vm718_vm9, 0.0, %v861_v16 }
 0x39d   : > { %v866_v18 = vsel %vm717_vm10, %v859_v15, %v865_v17 }
 0x39e   : > { %v867_v19 = vadd.f32 %v866_v18, %v2479_v46 }
 0x3a0   : > { %v869_v20 = vsel %vm868_vm11, %v867_v19, -inf }
 0x3a1   : > { %870 = vmax.xlane.f32.xlu1 %v869_v20 }
 0x3b2   : > { %931 = vrot.lane.b32.xlu1 %v2451_v31, %s2213_s8 }
 0x3b6   : > { %997 = vrot.lane.b32.xlu1 %v2543_v27, %s2213_s8 }
 0x42e   : > { %v871_v28 = vpop.xlane.xlu1 %870 }
 0x42f   : > { %v872_v29 = vsub.f32 %v867_v19, %v871_v28 }
 0x431   : > { %v873_v30 = vmul.f32 1.442695, %v872_v29 }
 0x432   : > { %v932_v48 = vpop.permute.xlu1 %931 }
 0x433   : > { %2087 = vpow2.f32 %v873_v30 }
 0x436   : > { %v998_v49 = vpop.permute.xlu1 %997 }
 0x43d   : > { %v2088_v33 = vpop.eup %2087 }
 0x43e   : > { %v875_v34 = vsel %vm868_vm11, %v2088_v33, 0.0 }
 0x43f   : > { %876 = vadd.xlane.f32.xlu0 %v875_v34 }
 0x455   : > { %934 = vrot.lane.b32.xlu0 %v2446_v26, %s2213_s8 }
 0x4cc   : > { %v877_v42 = vpop.xlane.xlu0 %876 }
 0x4cd   : > { %2089 = vrcp.f32 %v877_v42 }
 0x4d0   : > { %v935_v45 = vpop.permute.xlu0 %934 }
 0x4d1   : > { %v940_v47 = vsel %vm720_vm2, %v935_v45, 0 }
 0x4d7   : > { %v2090_v43 = vpop.eup %2089 }
 0x4d8   : > { %v879_v44 = vmul.f32 %v2090_v43, %v2088_v33 }
 0x4da   : > { %v880_v46 = vpack.c.bf16 %v879_v44, %v879_v44 }
 0x4dc   : > { %1919 = vmatmul.mubr.msk.bf16.vlgmr.msra.gmra.mrb[12].mxu1 %vm868_vm11, %v880_v46 }
 0x4dd   : > { %1923 = vmatpush3.bf16.xpose.msra.mxu1 %v940_v47  ;;  %1924 = vmatprep.mubr.msk.bf16.mxu1 %vm2205_vm0, %v2204_v0 }
 0x4de   : > { %1928 = vmatprep.subr.bf16.mxu1 %v2204_v0 }
 0x4e4   : > { %1925 = vmatmul.mubr.msk.bf16.vlgmr.msra.gmra.mrb[16].mxu1 %vm720_vm2, %v932_v48 }
 0x4e5   : > { %1929 = vmatpush3.bf16.xpose.msra.mxu1 %v940_v47  ;;  %1930 = vmatprep.mubr.msk.bf16.mxu1 %vm2205_vm0, %v2204_v0 }
 0x4e6   : > { %1934 = vmatprep.subr.bf16.mxu1 %v2204_v0 }
 0x4ec   : > { %1931 = vmatmul.mubr.msk.bf16.vlgmr.msra.gmra.mrb[20].mxu1 %vm720_vm2, %v998_v49 }
 0x4ed   : > { %1936 = vmatprep.mubr.msk.bf16.mxu1 %vm2205_vm0, %v2204_v0 }
 0x5af   : > { %v921_v50 = vpop.f32.mrb[12].mxu1 }
 0x5b0   : > { %v927_v51 = vpack.c.bf16 %v921_v50, %v921_v50  ;;  %v1920_v53 = vpop.f32.mrb[13].mxu1 }
 0x5b1   : > { %v924_v54 = vpop.f32.mrb[14].mxu1 }
 0x5b2   : > { %929 = vst.msk [vmem:[%s2572_s29] sm:$0xf] %vm928_vm12, %v927_v51  ;;  %v1921_v55 = vpop.f32.mrb[15].mxu1 }
 0x5b7   : > { %v976_v56 = vpop.f32.mrb[16].mxu1 }
 0x5b8   : > { %v1926_v57 = vpop.f32.mrb[17].mxu1 }
 0x5b9   : > { %v979_v59 = vpop.f32.mrb[18].mxu1 }
 0x5ba   : > { %v1927_v60 = vpop.f32.mrb[19].mxu1 }
 0x5bf   : > { %v1036_v61 = vpop.f32.mrb[20].mxu1 }
 0x5c0   : > { %v1045_v62 = vrot.slane %v1036_v61, %v2472_v39  ;;  %v1050_v63 = vrot.slane %v1036_v61, %v2475_v40  ;;  %v1932_v1 = vpop.f32.mrb[21].mxu1 }
 0x5c1   : > { %v1039_v2 = vpop.f32.mrb[22].mxu1 }
 0x5c2   : > { %v1046_v3 = vadd.f32 %v1045_v62, %v976_v56  ;;  %v1051_v4 = vadd.f32 %v1050_v63, %v976_v56  ;;  %v1933_v5 = vpop.f32.mrb[23].mxu1 }
 0x5c4   : > { %1056 = vrot.lane.b32.xlu1 %v1051_v4, %s2208_s9  ;;  %1053 = vrot.lane.b32.xlu0 %v1051_v4, %s2207_s19 }
 0x5c8   : > { %1060 = vrot.lane.b32.xlu0 %v1051_v4, %s2206_s17 }
 0x636   : > { %v1054_v6 = vpop.permute.xlu0 %1053  ;;  %v1057_v7 = vpop.permute.xlu1 %1056 }
 0x637   : > { %v1059_v8 = vsel %vm826_vm3, %v1054_v6, %v1057_v7 }
 0x63a   : > { %v1061_v9 = vpop.permute.xlu0 %1060 }
 0x63b   : > { %v1063_v12 = vsel %vm2485_vm4, %v1059_v8, %v1061_v9 }
 0x63c   : > { %1068 = vrot.lane.b32.xlu0 %v1063_v12, %s2209_s10  ;;  %1065 = vrot.lane.b32.xlu1 %v1063_v12, %s2210_s14 }
 0x6ae   : > { %v1069_v13 = vpop.permute.xlu0 %1068  ;;  %v1066_v14 = vpop.permute.xlu1 %1065 }
 0x6af   : > { %v1071_v15 = vsel %vm841_vm5, %v1066_v14, %v1069_v13 }
 0x6b0   : > { %v1072_v16 = vsel %vm845_vm6, %v1071_v15, %v1063_v12 }
 0x6b1   : > { %1077 = vrot.lane.b32.xlu0 %v1072_v16, %s2211_s15  ;;  %1074 = vrot.lane.b32.xlu1 %v1072_v16, %s2212_s16 }
 0x723   : > { %v1078_v17 = vpop.permute.xlu0 %1077  ;;  %v1075_v18 = vpop.permute.xlu1 %1074 }
 0x724   : > { %v1080_v19 = vsel %vm854_vm7, %v1075_v18, %v1078_v17 }
 0x725   : > { %v1081_v20 = vsel %vm858_vm8, %v1080_v19, %v1072_v16 }
 0x726   : > { %v1083_v21 = vrot.slane %v1081_v20, 1 }
 0x728   : > { %v1086_v22 = vsel %vm718_vm9, 0.0, %v1083_v21 }
 0x729   : > { %v1087_v23 = vsel %vm717_vm10, %v1081_v20, %v1086_v22 }
 0x72a   : > { %v1088_v24 = vadd.f32 %v1087_v23, %v1046_v3 }
 0x72c   : > { %v1089_v25 = vsel %vm868_vm11, %v1088_v24, -inf }
 0x72d   : > { %1090 = vmax.xlane.f32.xlu1 %v1089_v25 }
 0x73e   : > { %1161 = vrot.lane.b32.xlu1 %v2446_v26, %s2215_s24 }
 0x742   : > { %1159 = vrot.lane.b32.xlu1 %v2451_v31, %s2215_s24 }
 0x7ba   : > { %v1091_v28 = vpop.xlane.xlu1 %1090 }
 0x7bb   : > { %v1092_v29 = vsub.f32 %v1088_v24, %v1091_v28 }
 0x7bd   : > { %v1093_v30 = vmul.f32 1.442695, %v1092_v29 }
 0x7be   : > { %v1162_v42 = vpop.permute.xlu1 %1161 }
 0x7bf   : > { %2091 = vpow2.f32 %v1093_v30  ;;  %v1167_v44 = vsel %vm720_vm2, %v1162_v42, 0 }
 0x7c2   : > { %v1160_v45 = vpop.permute.xlu1 %1159 }
 0x7c9   : > { %v2092_v33 = vpop.eup %2091 }
 0x7ca   : > { %v1095_v34 = vsel %vm868_vm11, %v2092_v33, 0.0 }
 0x7cb   : > { %1096 = vadd.xlane.f32.xlu0 %v1095_v34 }
 0x7e1   : > { %1102 = vrot.lane.b32.xlu0 %v2548_v41, %s2213_s8 }
 0x7e5   : > { %1209 = vrot.lane.b32.xlu0 %v2543_v27, %s2215_s24 }
 0x858   : > { %v1097_v35 = vpop.xlane.xlu0 %1096 }
 0x859   : > { %2093 = vrcp.f32 %v1097_v35 }
 0x85c   : > { %v1103_v37 = vpop.permute.xlu0 %1102 }
 0x85d   : > { %v1108_v38 = vsel %vm707_vm1, %v1103_v37, 0 }
 0x85e   : > { %1935 = vmatpush3.bf16.msra.mxu1 %v1108_v38 }
 0x85f   : > { %1940 = vmatprep.subr.bf16.mxu1 %v2204_v0 }
 0x860   : > { %v1210_v46 = vpop.permute.xlu0 %1209 }
 0x863   : > { %v2094_v36 = vpop.eup %2093 }
 0x864   : > { %v1099_v32 = vmul.f32 %v2094_v36, %v2092_v33 }
 0x866   : > { %v1100_v43 = vpack.c.bf16 %v1099_v32, %v1099_v32 }
 0x868   : > { %1937 = vmatmul.mubr.msk.bf16.vlgmr.msra.gmra.mrb[24].mxu1 %vm868_vm11, %v1100_v43 }
 0x869   : > { %1941 = vmatpush3.bf16.xpose.msra.mxu1 %v1167_v44  ;;  %1942 = vmatprep.mubr.msk.bf16.mxu1 %vm2205_vm0, %v2204_v0 }
 0x86a   : > { %1946 = vmatprep.subr.bf16.mxu1 %v2204_v0 }
 0x870   : > { %1943 = vmatmul.mubr.msk.bf16.vlgmr.msra.gmra.mrb[28].mxu1 %vm720_vm2, %v1160_v45 }
 0x871   : > { %1947 = vmatpush3.bf16.xpose.msra.mxu1 %v1167_v44  ;;  %1948 = vmatprep.mubr.msk.bf16.mxu1 %vm2205_vm0, %v2204_v0 }
 0x872   : > { %1958 = vmatprep.subr.bf16.mxu1 %v2204_v0 }
 0x878   : > { %1949 = vmatmul.mubr.msk.bf16.vlgmr.msra.gmra.mrb[32].mxu1 %vm720_vm2, %v1210_v46 }
 0x879   : > { %1960 = vmatprep.mubr.msk.bf16.mxu1 %vm2205_vm0, %v2204_v0 }
 0x93b   : > { %v2621_v47 = vpop.f32.mrb[24].mxu1 }
 0x93c   : > { %v1938_v48 = vpop.f32.mrb[25].mxu1 }
 0x93d   : > { %v1147_v49 = vpop.f32.mrb[26].mxu1 }
 0x93e   : > { %v1939_v50 = vpop.f32.mrb[27].mxu1 }
 0x943   : > { %v1203_v51 = vpop.f32.mrb[28].mxu1 }
 0x944   : > { %v1944_v53 = vpop.f32.mrb[29].mxu1 }
 0x945   : > { %v1206_v54 = vpop.f32.mrb[30].mxu1 }
 0x946   : > { %v1945_v55 = vpop.f32.mrb[31].mxu1 }
 0x94b   : > { %v1248_v56 = vpop.f32.mrb[32].mxu1 }
 0x94c   : > { %v1257_v57 = vrot.slane %v1248_v56, %v2472_v39  ;;  %v1262_v59 = vrot.slane %v1248_v56, %v2475_v40  ;;  %v1950_v60 = vpop.f32.mrb[33].mxu1 }
 0x94d   : > { %v1251_v61 = vpop.f32.mrb[34].mxu1 }
 0x94e   : > { %v1258_v62 = vadd.f32 %v1257_v57, %v1203_v51  ;;  %v1263_v63 = vadd.f32 %v1262_v59, %v1203_v51  ;;  %v1951_v1 = vpop.f32.mrb[35].mxu1 }
 0x950   : > { %1268 = vrot.lane.b32.xlu0 %v1263_v63, %s2208_s9  ;;  %1265 = vrot.lane.b32.xlu1 %v1263_v63, %s2207_s19 }
 0x954   : > { %1272 = vrot.lane.b32.xlu1 %v1263_v63, %s2206_s17 }
 0x9c2   : > { %v1266_v2 = vpop.permute.xlu1 %1265  ;;  %v1269_v3 = vpop.permute.xlu0 %1268 }
 0x9c3   : > { %v1271_v4 = vsel %vm826_vm3, %v1266_v2, %v1269_v3 }
 0x9c6   : > { %v1273_v5 = vpop.permute.xlu1 %1272 }
 0x9c7   : > { %v1275_v6 = vsel %vm2485_vm4, %v1271_v4, %v1273_v5 }
 0x9c8   : > { %1280 = vrot.lane.b32.xlu1 %v1275_v6, %s2209_s10  ;;  %1277 = vrot.lane.b32.xlu0 %v1275_v6, %s2210_s14 }
 0xa3a   : > { %v1281_v7 = vpop.permute.xlu1 %1280  ;;  %v1278_v8 = vpop.permute.xlu0 %1277 }
 0xa3b   : > { %v1283_v9 = vsel %vm841_vm5, %v1278_v8, %v1281_v7 }
 0xa3c   : > { %v1284_v12 = vsel %vm845_vm6, %v1283_v9, %v1275_v6  ;;  %v1790_v9 = vpack.c.bf16 %v2621_v47, %v2621_v47 }
 0xa3d   : > { %1289 = vrot.lane.b32.xlu1 %v1284_v12, %s2211_s15  ;;  %1286 = vrot.lane.b32.xlu0 %v1284_v12, %s2212_s16 }
 0xaaf   : > { %v1290_v13 = vpop.permute.xlu1 %1289  ;;  %v1287_v14 = vpop.permute.xlu0 %1286 }
 0xab0   : > { %v1292_v15 = vsel %vm854_vm7, %v1287_v14, %v1290_v13 }
 0xab1   : > { %v1293_v16 = vsel %vm858_vm8, %v1292_v15, %v1284_v12 }
 0xab2   : > { %v1295_v17 = vrot.slane %v1293_v16, 1 }
 0xab4   : > { %v1298_v18 = vsel %vm718_vm9, 0.0, %v1295_v17 }
 0xab5   : > { %v1299_v19 = vsel %vm717_vm10, %v1293_v16, %v1298_v18 }
 0xab6   : > { %v1300_v20 = vadd.f32 %v1299_v19, %v1258_v62 }
 0xab8   : > { %v1301_v21 = vsel %vm868_vm11, %v1300_v20, -inf }
 0xab9   : > { %1302 = vmax.xlane.f32.xlu0 %v1301_v21 }
 0xacf   : > { %1313 = vrot.lane.b32.xlu0 %v2548_v41, %s2215_s24 }
 0xad3   : > { %1420 = vrot.lane.b32.xlu0 %v2543_v27, %s2216_s25 }
 0xb46   : > { %v1303_v22 = vpop.xlane.xlu0 %1302 }
 0xb47   : > { %v1304_v23 = vsub.f32 %v1300_v20, %v1303_v22 }
 0xb49   : > { %v1305_v24 = vmul.f32 1.442695, %v1304_v23 }
 0xb4a   : > { %v1314_v25 = vpop.permute.xlu0 %1313 }
 0xb4b   : > { %2095 = vpow2.f32 %v1305_v24  ;;  %v1319_v28 = vsel %vm707_vm1, %v1314_v25, 0 }
 0xb4c   : > { %1953 = vmatpush3.bf16.msra.mxu0 %v1319_v28 }
 0xb4d   : > { %1964 = vmatprep.subr.bf16.mxu0 %v2204_v0 }
 0xb55   : > { %v2096_v29 = vpop.eup %2095 }
 0xb56   : > { %v1307_v30 = vsel %vm868_vm11, %v2096_v29, 0.0 }
 0xb57   : > { %1308 = vadd.xlane.f32.xlu1 %v1307_v30 }
 0xb68   : > { %1372 = vrot.lane.b32.xlu1 %v2446_v26, %s2216_s25  ;;  %v1421_v26 = vpop.permute.xlu0 %1420 }
 0xb6c   : > { %1370 = vrot.lane.b32.xlu1 %v2451_v31, %s2216_s25 }
 0xbe4   : > { %v1309_v27 = vpop.xlane.xlu1 %1308 }
 0xbe5   : > { %2097 = vrcp.f32 %v1309_v27 }
 0xbe8   : > { %v1373_v33 = vpop.permute.xlu1 %1372 }
 0xbe9   : > { %v1378_v34 = vsel %vm720_vm2, %v1373_v33, 0 }
 0xbea   : > { %1959 = vmatpush3.bf16.xpose.msra.mxu1 %v1378_v34 }
 0xbeb   : > { %1970 = vmatprep.subr.bf16.mxu1 %v2204_v0 }
 0xbec   : > { %v1371_v38 = vpop.permute.xlu1 %1370 }
 0xbef   : > { %v2098_v35 = vpop.eup %2097 }
 0xbf0   : > { %v1311_v37 = vmul.f32 %v2098_v35, %v2096_v29 }
 0xbf1   : > { %1961 = vmatmul.mubr.msk.bf16.vlgmr.msra.gmra.mrb[36].mxu1 %vm720_vm2, %v1371_v38 }
 0xbf2   : > { %v1312_v36 = vpack.c.bf16 %v1311_v37, %v1311_v37  ;;  %1972 = vmatprep.mubr.msk.bf16.mxu1 %vm2205_vm0, %v2204_v0 }
 0xbf4   : > { %1955 = vmatmul.mubr.msk.bf16.vlgmr.msra.gmra.mrb[8].mxu0 %vm868_vm11, %v1312_v36 }
 0xbf5   : > { %1965 = vmatpush3.bf16.xpose.msra.mxu0 %v1378_v34  ;;  %1966 = vmatprep.mubr.msk.bf16.mxu0 %vm2205_vm0, %v2204_v0 }
 0xbfc   : > { %1967 = vmatmul.mubr.msk.bf16.vlgmr.msra.gmra.mrb[12].mxu0 %vm720_vm2, %v1421_v26 }
 0xcc4   : > { %v1414_v31 = vpop.f32.mrb[36].mxu1 }
 0xcc5   : > { %v1962_v32 = vpop.f32.mrb[37].mxu1 }
 0xcc6   : > { %v1417_v42 = vpop.f32.mrb[38].mxu1 }
 0xcc7   : > { %v1355_v43 = vpop.f32.mrb[8].mxu0  ;;  %v1963_v44 = vpop.f32.mrb[39].mxu1 }
 0xcc8   : > { %v1956_v45 = vpop.f32.mrb[9].mxu0  ;;  %v1791_v10 = vpack.c.bf16 %v1355_v43, %v1355_v43 }
 0xcc9   : > { %v1358_v46 = vpop.f32.mrb[10].mxu0 }
 0xcca   : > { %v1957_v48 = vpop.f32.mrb[11].mxu0 }
 0xccf   : > { %v1459_v49 = vpop.f32.mrb[12].mxu0 }
 0xcd0   : > { %v1468_v50 = vrot.slane %v1459_v49, %v2472_v39  ;;  %v1473_v51 = vrot.slane %v1459_v49, %v2475_v40  ;;  %v1968_v53 = vpop.f32.mrb[13].mxu0 }
 0xcd1   : > { %v1462_v54 = vpop.f32.mrb[14].mxu0 }
 0xcd2   : > { %v1469_v55 = vadd.f32 %v1468_v50, %v1414_v31  ;;  %v1474_v0 = vadd.f32 %v1473_v51, %v1414_v31  ;;  %v1969_v56 = vpop.f32.mrb[15].mxu0 }
 0xcd4   : > { %1479 = vrot.lane.b32.xlu1 %v1474_v0, %s2208_s9  ;;  %1476 = vrot.lane.b32.xlu0 %v1474_v0, %s2207_s19 }
 0xcd8   : > { %1483 = vrot.lane.b32.xlu0 %v1474_v0, %s2206_s17 }
 0xd46   : > { %v1477_v57 = vpop.permute.xlu0 %1476  ;;  %v1480_v59 = vpop.permute.xlu1 %1479 }
 0xd47   : > { %v1482_v60 = vsel %vm826_vm3, %v1477_v57, %v1480_v59 }
 0xd4a   : > { %v1484_v61 = vpop.permute.xlu0 %1483 }
 0xd4b   : > { %v1486_v39 = vsel %vm2485_vm4, %v1482_v60, %v1484_v61 }
 0xd4c   : > { %1491 = vrot.lane.b32.xlu0 %v1486_v39, %s2209_s10  ;;  %1488 = vrot.lane.b32.xlu1 %v1486_v39, %s2210_s14 }
 0xdbe   : > { %v1492_v40 = vpop.permute.xlu0 %1491  ;;  %v1489_v62 = vpop.permute.xlu1 %1488 }
 0xdbf   : > { %v1494_v63 = vsel %vm841_vm5, %v1489_v62, %v1492_v40 }
 0xdc0   : > { %v1495_v1 = vsel %vm845_vm6, %v1494_v63, %v1486_v39 }
 0xdc1   : > { %1500 = vrot.lane.b32.xlu0 %v1495_v1, %s2211_s15  ;;  %1497 = vrot.lane.b32.xlu1 %v1495_v1, %s2212_s16 }
 0xe33   : > { %v1501_v2 = vpop.permute.xlu0 %1500  ;;  %v1498_v3 = vpop.permute.xlu1 %1497 }
 0xe34   : > { %v1503_v52 = vsel %vm854_vm7, %v1498_v3, %v1501_v2 }
 0xe35   : > { %v1504_v4 = vsel %vm858_vm8, %v1503_v52, %v1495_v1 }
 0xe36   : > { %v1506_v5 = vrot.slane %v1504_v4, 1 }
 0xe38   : > { %v1509_v6 = vsel %vm718_vm9, 0.0, %v1506_v5 }
 0xe39   : > { %v1510_v58 = vsel %vm717_vm10, %v1504_v4, %v1509_v6 }
 0xe3a   : > { %v1511_v7 = vadd.f32 %v1510_v58, %v1469_v55 }
 0xe3c   : > { %v1512_v8 = vsel %vm868_vm11, %v1511_v7, -inf }
 0xe3d   : > { %1513 = vmax.xlane.f32.xlu1 %v1512_v8 }
 0xe4e   : > { %1154 = vrot.lane.b32.xlu1 %v1790_v9, %s2216_s25 }
 0xe52   : > { %1365 = vrot.lane.b32.xlu1 %v1791_v10, %s2215_s24 }
 0xeca   : > { %v1514_v12 = vpop.xlane.xlu1 %1513 }
 0xecb   : > { %v1515_v13 = vsub.f32 %v1511_v7, %v1514_v12 }
 0xecd   : > { %v1516_v14 = vmul.f32 1.442695, %v1515_v13 }
 0xece   : > { %v1155_v15 = vpop.permute.xlu1 %1154 }
 0xecf   : > { %2099 = vpow2.f32 %v1516_v14  ;;  %1158 = vst.msk [vmem:[%s2572_s29] sm:$0xf] %vm1157_vm13, %v1155_v15 }
 0xed2   : > { %v1366_v11 = vpop.permute.xlu1 %1365 }
 0xed3   : > { %1369 = vst.msk [vmem:[%s2572_s29] sm:$0xf] %vm1368_vm14, %v1366_v11 }
 0xed9   : > { %v2100_v16 = vpop.eup %2099 }
 0xeda   : > { %v1518_v17 = vsel %vm868_vm11, %v2100_v16, 0.0 }
 0xedb   : > { %1519 = vadd.xlane.f32.xlu0 %v1518_v17 }
 0xef1   : > { %1524 = vrot.lane.b32.xlu0 %v2548_v41, %s2216_s25 }
 0xf68   : > { %v1520_v47 = vpop.xlane.xlu0 %1519 }
 0xf69   : > { %2101 = vrcp.f32 %v1520_v47 }
 0xf6c   : > { %v1525_v18 = vpop.permute.xlu0 %1524 }
 0xf6d   : > { %v1530_v19 = vsel %vm707_vm1, %v1525_v18, 0 }
 0xf6e   : > { %1971 = vmatpush3.bf16.msra.mxu1 %v1530_v19 }
 0xf73   : > { %v2102_v20 = vpop.eup %2101 }
 0xf74   : > { %v1522_v21 = vmul.f32 %v2102_v20, %v2100_v16 }
 0xf76   : > { %v1523_v22 = vpack.c.bf16 %v1522_v21, %v1522_v21 }
 0xf78   : > { %1973 = vmatmul.mubr.msk.bf16.vlgmr.msra.gmra.mrb[40].mxu1 %vm868_vm11, %v1523_v22 }
0x104b   : > { %v1566_v23 = vpop.f32.mrb[40].mxu1 }
0x104c   : > { %v1792_v24 = vpack.c.bf16 %v1566_v23, %v1566_v23  ;;  %v1974_v25 = vpop.f32.mrb[41].mxu1 }
0x104d   : > { %v1569_v28 = vpop.f32.mrb[42].mxu1 }
0x104e   : > { %1576 = vrot.lane.b32.xlu0 %v1792_v24, %s2213_s8  ;;  %v1975_v29 = vpop.f32.mrb[43].mxu1 }
0x10c0   : > { %v1577_v41 = vpop.permute.xlu0 %1576 }
0x10c1   : > { %1580 = vst.msk [vmem:[%s2572_s29] sm:$0xf] %vm1579_vm15, %v1577_v41 }
0x10c2 PF: > { %s19_s28 = sadd.s32 1, %s2199_s28   ;;  %s2738_s21 = smov %s2175_s22 }
0x10c3   : > { %p16_p6 = scmp.ge.s32.totalorder %s19_s28, 6   ;;  %s2739_s22 = smov %s2179_s23 }
0x10c4   : > { %s2740_s23 = smov %s2310_s11  ;;  %s2741_s24 = smov %s2191_s26 }
0x10c5   : > { %s2742_s25 = smov %s2195_s27  ;;  %s2743_s26 = smov %s2746_s30 }
0x10c6   : > { %s2744_s27 = smov %s2750_s7  ;;  %18 = sbr.rel (!%p16_p6) target bundleno = 5 (0x5), region = 99 }
0x10cd   :  { %1608 = vsyncpa [#allocation3], 1 }
0x10ce   :  { %1610 = vsyncpa [#allocation3 + $0x1], 1 }

</bundles_post_ra>
